<compile_context>
chip_gen: v7x
topology: tpu7x:2x2x1
jax: 0.10.0
libtpu: 0.0.40
codegen_flags: <defaults>
</compile_context>

<pallas_src>
import functools
import math

import jax
import jax.numpy as jnp
from jax import lax
from jax.experimental import pallas as pl
from jax.experimental.pallas import tpu as pltpu

FEATURES = 4          # `features`
EMBED = 8             # `embed_size`
RET_SIZE = 8          # number of retrieved neighbours
FEAT_NUM = 100        # synthetic dataset_summary['feat_num']
HIDDEN_LAYERS = [32, 16, 8]
BN_EPS = 1e-5
DEFAULT_TILE_B = 512  # lane-axis batch tile (multiple of 128)


def _round_up(x, m):
    return ((x + m - 1) // m) * m


# --------------------------- fused RIM kernel (whole forward) -------------------------
def _rim_kernel(n_extra_blocks, batch, tile_b, *refs):
    (x_ref, ret_ref, lab_ref, valid_ref,
     watt_ref, w0_ref, b0_ref, g0_ref, be0_ref) = refs[:9]
    idx = 9
    extra = []
    for _ in range(n_extra_blocks):
        extra.append(refs[idx:idx + 4])
        idx += 4
    wout_h_ref, wout_l_ref, bout_ref = refs[idx], refs[idx + 1], refs[idx + 2]
    out_ref = refs[idx + 3]

    d = x_ref.shape[0]                        # F*E (sublane axis)
    r_n = ret_ref.shape[0] // d               # R
    e = lab_ref.shape[0] // r_n               # E
    f_n = d // e                              # F
    n_fields = 2 * f_n + 1

    xT = x_ref[...]                           # [d, T]   (T on lanes)
    retT = ret_ref[...]                       # [R*d, T]
    labT = lab_ref[...]                       # [R*E, T]
    valid = valid_ref[...]                    # [1, T] int32

    # ---- attention: q-projection on the MXU (N = tile_b), masked softmax over R ------
    qT = jnp.dot(watt_ref[...], xT, preferred_element_type=jnp.float32)   # [d, T]
    scale = 1.0 / math.sqrt(d)

    s_rows = []
    for r in range(r_n):                      # tile-aligned sublane slices, full lane width
        s = jnp.sum(qT * retT[r * d:(r + 1) * d, :], axis=0, keepdims=True) * scale
        s_rows.append(jnp.where(valid > r, s, jnp.float32(-1e6)))         # [1, T]
    m = s_rows[0]
    for r in range(1, r_n):
        m = jnp.maximum(m, s_rows[r])
    e_rows = [jnp.exp(s - m) for s in s_rows]                             # EUP
    denom = e_rows[0]
    for r in range(1, r_n):
        denom = denom + e_rows[r]
    inv = pl.reciprocal(denom, approx=True)                               # EUP, [1, T]

    a0 = e_rows[0] * inv
    afT = a0 * retT[:d, :]                                                # [d, T]
    alT = a0 * labT[:e, :]                                                # [E, T]
    for r in range(1, r_n):
        a = e_rows[r] * inv
        afT = afT + a * retT[r * d:(r + 1) * d, :]
        alT = alT + a * labT[r * e:(r + 1) * e, :]

    # ---- pairwise interactions, delta-grouped; the per-pair 8-wide reduction and the
    # ---- weighted sum both happen inside one MXU matmul (column-replicated w0_big) ----
    cT = jnp.concatenate([xT, afT, alT], axis=0)                          # [72, T]
    pieces = [cT]
    for delta in range(1, n_fields):
        n = n_fields - delta
        pieces.append(cT[:n * e, :] * cT[delta * e:, :])                  # [(n*e), T]
    big = jnp.concatenate(pieces, axis=0)                                 # [360, T]

    h = (jnp.dot(w0_ref[...], big, preferred_element_type=jnp.float32)
         + b0_ref[...])                                                   # [H0, T]

    # ---- BatchNorm1d (training stats over the batch-lane axis) + ReLU ----------------
    col = (lax.broadcasted_iota(jnp.int32, (1, tile_b), 1)
           + pl.program_id(0) * tile_b)
    cmask = (col < batch).astype(jnp.float32)                             # [1, T]
    count = jnp.maximum(jnp.sum(cmask, axis=1, keepdims=True), 1.0)       # [1, 1]
    inv_cnt = 1.0 / count

    def bn_relu(hv, g_ref, be_ref):
        mean = jnp.sum(hv * cmask, axis=1, keepdims=True) * inv_cnt       # [H, 1]
        dev = hv - mean
        var = jnp.sum((dev * dev) * cmask, axis=1, keepdims=True) * inv_cnt
        hv = dev * lax.rsqrt(var + BN_EPS) * g_ref[...] + be_ref[...]
        return jnp.maximum(hv, 0.0)

    h = bn_relu(h, g0_ref, be0_ref)
    for (w_ref, b_ref, g_ref, be_ref) in extra:
        h = jnp.dot(w_ref[...], h, preferred_element_type=jnp.float32) + b_ref[...]
        h = bn_relu(h, g_ref, be_ref)

    # ---- output head: [H_last, T] lane-dense store ------------------------------------
    out = (jnp.dot(wout_h_ref[...], h, preferred_element_type=jnp.float32)
           + jnp.dot(wout_l_ref[...], alT, preferred_element_type=jnp.float32)
           + bout_ref[...])
    out_ref[...] = out                                                    # [H_last, T]


# ---------------------------- parameters (deterministic) ------------------------------
def init_params(key):
    ks = jax.random.split(key, 10)
    d = FEATURES * EMBED
    d_in = (2 * FEATURES + 1) * (EMBED + FEATURES)
    params = {}
    params['emb_feat'] = 0.1 * jax.random.normal(ks[0], (FEAT_NUM, EMBED), jnp.float32)
    params['emb_lab'] = 0.1 * jax.random.normal(ks[1], (2, EMBED), jnp.float32)
    w_att = 0.1 * jax.random.normal(ks[2], (d, d), jnp.float32)  # torch Linear weight [out, in]
    params['w_att_t'] = w_att.T
    blocks = []
    dims = [d_in] + HIDDEN_LAYERS[:-1]                            # e.g. [108, 32, 16]
    for i in range(len(HIDDEN_LAYERS) - 1):
        w = 0.1 * jax.random.normal(ks[3 + i], (dims[i + 1], dims[i]), jnp.float32)
        b = 0.1 * jax.random.normal(ks[6 + i], (1, dims[i + 1]), jnp.float32)
        g = jnp.ones((1, dims[i + 1]), jnp.float32)               # BatchNorm1d weight init
        beta = jnp.zeros((1, dims[i + 1]), jnp.float32)           # BatchNorm1d bias init
        blocks.append((w.T, b, g, beta))                          # w.T: [in, out]
    params['blocks'] = blocks
    h_pen = HIDDEN_LAYERS[-2]
    w_out = 0.1 * jax.random.normal(ks[9], (HIDDEN_LAYERS[-1], h_pen + EMBED), jnp.float32)
    params['w_out_t'] = w_out.T                                   # [h_pen + E, H_last]
    params['b_out'] = 0.1 * jax.random.normal(ks[5], (1, HIDDEN_LAYERS[-1]), jnp.float32)
    return params


def _pair_expand_columns():
    """Column indices into W0 that replicate each upper-triangle pair weight E times,
    in the kernel's delta-grouped pair order."""
    n_fields = 2 * FEATURES + 1
    base = 2 * FEATURES * EMBED + EMBED      # 72: where the pair columns start in W0
    orig = {}
    p = 0
    for i in range(n_fields):
        for j in range(i + 1, n_fields):
            orig[(i, j)] = p
            p += 1
    idx = []
    for delta in range(1, n_fields):
        for i in range(n_fields - delta):
            idx.extend([base + orig[(i, i + delta)]] * EMBED)
    return jnp.asarray(idx, dtype=jnp.int32)   # length 36 * E = 288


def _prep_kernel_params(params):
    E = EMBED
    h_pen = HIDDEN_LAYERS[-2]
    base = 2 * FEATURES * E + E                                   # 72
    w0_t, b0, g0, be0 = params['blocks'][0]                       # w0_t: [108, H0]
    W0 = w0_t.T                                                   # [H0, 108] torch layout
    w0_big = jnp.concatenate([W0[:, :base], W0[:, _pair_expand_columns()]], axis=1)
    W_out = params['w_out_t'].T                                   # [H_last, h_pen + E]
    return {
        'w_att': params['w_att_t'].T,                             # [d, d] torch [out, in]
        'w0_big': w0_big,                                         # [H0, 360]
        'b0': b0.T, 'g0': g0.T, 'be0': be0.T,                     # columns [H0, 1]
        'extra_blocks': [(w_t.T, b.T, g.T, be.T)
                         for (w_t, b, g, be) in params['blocks'][1:]],
        'w_out_h': W_out[:, :h_pen],                              # [H_last, h_pen]
        'w_out_l': W_out[:, h_pen:],                              # [H_last, E]
        'b_out': params['b_out'].T,                               # [H_last, 1]
    }


# ---------------------------------- RIM forward ---------------------------------------
def rim_forward(params, x, ret, ret_label, valid_lens, use_embed=True, prt_hint=False,
                tile_b=None):
    F_, E, R = FEATURES, EMBED, RET_SIZE
    d = F_ * E
    H_last = HIDDEN_LAYERS[-1]

    x_emb = params['emb_feat'][x] if use_embed else x             # [B, F, E]
    B = x_emb.shape[0]
    ret_emb = params['emb_feat'][ret]                             # [B, R, F, E]
    lab_emb = params['emb_lab'][ret_label]                        # [B, R, E]

    # transpose to batch-on-lanes layout in the wrapper (cheap XLA transposes)
    xT = x_emb.reshape(B, d).astype(jnp.float32).T                # [d, B]
    retT = ret_emb.reshape(B, R * d).astype(jnp.float32).T        # [R*d, B]
    labT = lab_emb.reshape(B, R * E).astype(jnp.float32).T        # [R*E, B]
    validT = valid_lens.astype(jnp.int32).reshape(1, B)           # [1, B]

    # lane tiling: multiple of 128; split batches >=256 into >=2 grid steps so both
    # v7x TensorCores are used; cap at 512 (per-tile VMEM footprint ~1-2 MiB).
    b128 = _round_up(B, 128)
    if tile_b is None:
        if b128 <= 128:
            tile_b = 128
        else:
            tile_b = min(DEFAULT_TILE_B, _round_up((b128 + 1) // 2, 128))
    tile_b = max(128, _round_up(tile_b, 128))
    b_pad = _round_up(B, tile_b)
    if b_pad != B:
        pad = b_pad - B
        xT = jnp.pad(xT, ((0, 0), (0, pad)))
        retT = jnp.pad(retT, ((0, 0), (0, pad)))
        labT = jnp.pad(labT, ((0, 0), (0, pad)))
        validT = jnp.pad(validT, ((0, 0), (0, pad)), constant_values=1)

    kp = _prep_kernel_params(params)
    n_extra = len(params['blocks']) - 1

    args = [xT, retT, labT, validT,
            kp['w_att'], kp['w0_big'], kp['b0'], kp['g0'], kp['be0']]
    for blk in kp['extra_blocks']:
        args.extend(blk)
    args.extend([kp['w_out_h'], kp['w_out_l'], kp['b_out']])

    data_specs = [
        pl.BlockSpec((d, tile_b), lambda i: (0, i)),
        pl.BlockSpec((R * d, tile_b), lambda i: (0, i)),
        pl.BlockSpec((R * E, tile_b), lambda i: (0, i)),
        pl.BlockSpec((1, tile_b), lambda i: (0, i)),
    ]
    weight_specs = [pl.BlockSpec(a.shape, lambda i: (0, 0)) for a in args[4:]]

    kernel = functools.partial(_rim_kernel, n_extra, B, tile_b)
    outT = pl.pallas_call(
        kernel,
        grid=(b_pad // tile_b,),
        in_specs=data_specs + weight_specs,
        out_specs=pl.BlockSpec((H_last, tile_b), lambda i: (0, i)),
        out_shape=jax.ShapeDtypeStruct((H_last, b_pad), jnp.float32),
        compiler_params=pltpu.CompilerParams(dimension_semantics=("parallel",)),
    )(*args)

    out = outT[:, :B].T                                           # [B, H_last]

    if prt_hint:
        # TODO(synk): debug-only hint recomputed in plain JAX (not on the hot path).
        x_fla = x_emb.reshape(B, d).astype(jnp.float32)
        keys = ret_emb.reshape(B, R, d).astype(jnp.float32)
        labs = lab_emb.reshape(B, R, E).astype(jnp.float32)
        q = x_fla @ params['w_att_t']
        scores = jnp.einsum('bd,brd->br', q, keys) / math.sqrt(d)
        mask = jnp.arange(R)[None, :] < valid_lens[:, None]
        attn = jax.nn.softmax(jnp.where(mask, scores, -1e6), axis=-1)
        af = jnp.einsum('br,brd->bd', attn, keys)
        al = jnp.einsum('br,bre->be', attn, labs)
        aggre_res = jnp.concatenate([af.reshape(B, F_, E), al[:, None, :]], axis=1)
        return out, aggre_res
    return out


# ----------------------------- pure-JAX reference (checking) --------------------------
def rim_reference(params, x, ret, ret_label, valid_lens):
    F_, E = FEATURES, EMBED
    x_emb = params['emb_feat'][x]
    B = x_emb.shape[0]
    ret_emb = params['emb_feat'][ret]
    lab_emb = params['emb_lab'][ret_label]
    x_fla = x_emb.reshape(B, F_ * E)
    keys = ret_emb.reshape(B, ret_emb.shape[1], F_ * E)
    d = F_ * E
    q = x_fla @ params['w_att_t']
    scores = jnp.einsum('bd,brd->br', q, keys) / math.sqrt(d)
    mask = jnp.arange(keys.shape[1])[None, :] < valid_lens[:, None]
    scores = jnp.where(mask, scores, -1e6)
    attn = jax.nn.softmax(scores, axis=-1)
    aggre_feat = jnp.einsum('br,brd->bd', attn, keys)
    aggre_lab = jnp.einsum('br,bre->be', attn, lab_emb)
    c_combine = jnp.concatenate([x_fla.reshape(B, F_, E),
                                 aggre_feat.reshape(B, F_, E),
                                 aggre_lab[:, None, :]], axis=1)
    inter = jnp.einsum('bne,bme->bnm', c_combine, c_combine)
    N = 2 * F_ + 1
    iu, ju = jnp.triu_indices(N, k=1)
    c_res = inter[:, iu, ju]
    h = jnp.concatenate([x_fla, aggre_feat, aggre_lab, c_res], axis=1)
    for (w_t, b, g, beta) in params['blocks']:
        h = h @ w_t + b
        mu = jnp.mean(h, axis=0, keepdims=True)
        var = jnp.mean((h - mu) ** 2, axis=0, keepdims=True)
        h = (h - mu) / jnp.sqrt(var + BN_EPS) * g + beta
        h = jnp.maximum(h, 0.0)
    h = jnp.concatenate([h, aggre_lab], axis=1)
    return h @ params['w_out_t'] + params['b_out']


if __name__ == "__main__":
    key = jax.random.PRNGKey(0)
    kp, kx, kr, kl, kv = jax.random.split(key, 5)
    params = init_params(kp)

    B, R = 8, RET_SIZE
    x = jax.random.randint(kx, (B, FEATURES), 0, FEAT_NUM, dtype=jnp.int32)
    ret = jax.random.randint(kr, (B, R, FEATURES), 0, FEAT_NUM, dtype=jnp.int32)
    ret_label = jax.random.randint(kl, (B, R), 0, 2, dtype=jnp.int32)
    valid_lens = jax.random.randint(kv, (B,), 1, R + 1, dtype=jnp.int32)

    fwd = jax.jit(rim_forward)
    out = fwd(params, x, ret, ret_label, valid_lens)
    out = jax.block_until_ready(out)
    assert out.shape == (B, HIDDEN_LAYERS[-1])

    ref = rim_reference(params, x, ret, ret_label, valid_lens)
    if not jnp.allclose(out, ref, rtol=2e-2, atol=2e-2):
        raise AssertionError("Pallas RIM output does not match JAX reference")

    print("KERNEL_OK")
</pallas_src>

<mosaic_0001>
module attributes {stable_mosaic.version = 11 : i64} {
  func.func @_rim_kernel(%arg0: i32, %arg1: memref<32x128xf32, #tpu.memory_space<vmem>>, %arg2: memref<256x128xf32, #tpu.memory_space<vmem>>, %arg3: memref<64x128xf32, #tpu.memory_space<vmem>>, %arg4: memref<1x128xi32, #tpu.memory_space<vmem>>, %arg5: memref<32x32xf32, #tpu.memory_space<vmem>>, %arg6: memref<32x360xf32, #tpu.memory_space<vmem>>, %arg7: memref<32x1xf32, #tpu.memory_space<vmem>>, %arg8: memref<32x1xf32, #tpu.memory_space<vmem>>, %arg9: memref<32x1xf32, #tpu.memory_space<vmem>>, %arg10: memref<16x32xf32, #tpu.memory_space<vmem>>, %arg11: memref<16x1xf32, #tpu.memory_space<vmem>>, %arg12: memref<16x1xf32, #tpu.memory_space<vmem>>, %arg13: memref<16x1xf32, #tpu.memory_space<vmem>>, %arg14: memref<8x16xf32, #tpu.memory_space<vmem>>, %arg15: memref<8x8xf32, #tpu.memory_space<vmem>>, %arg16: memref<8x1xf32, #tpu.memory_space<vmem>>, %arg17: memref<8x128xf32, #tpu.memory_space<vmem>>) attributes {dimension_semantics = [#tpu.dimension_semantics<parallel>], iteration_bounds = array<i64: 1>, scalar_prefetch = 0 : i64, scratch_operands = 0 : i64, tpu.core_type = #tpu.core_type<tc>, window_params = [{transform_indices = @transform_0, window_bounds = array<i64: 32, 128>}, {transform_indices = @transform_1, window_bounds = array<i64: 256, 128>}, {transform_indices = @transform_2, window_bounds = array<i64: 64, 128>}, {transform_indices = @transform_3, window_bounds = array<i64: 1, 128>}, {pipeline_mode = #tpu.pipeline_mode<synchronous>, transform_indices = @transform_4, window_bounds = array<i64: 32, 32>}, {pipeline_mode = #tpu.pipeline_mode<synchronous>, transform_indices = @transform_5, window_bounds = array<i64: 32, 360>}, {pipeline_mode = #tpu.pipeline_mode<synchronous>, transform_indices = @transform_6, window_bounds = array<i64: 32, 1>}, {pipeline_mode = #tpu.pipeline_mode<synchronous>, transform_indices = @transform_7, window_bounds = array<i64: 32, 1>}, {pipeline_mode = #tpu.pipeline_mode<synchronous>, transform_indices = @transform_8, window_bounds = array<i64: 32, 1>}, {pipeline_mode = #tpu.pipeline_mode<synchronous>, transform_indices = @transform_9, window_bounds = array<i64: 16, 32>}, {pipeline_mode = #tpu.pipeline_mode<synchronous>, transform_indices = @transform_10, window_bounds = array<i64: 16, 1>}, {pipeline_mode = #tpu.pipeline_mode<synchronous>, transform_indices = @transform_11, window_bounds = array<i64: 16, 1>}, {pipeline_mode = #tpu.pipeline_mode<synchronous>, transform_indices = @transform_12, window_bounds = array<i64: 16, 1>}, {pipeline_mode = #tpu.pipeline_mode<synchronous>, transform_indices = @transform_13, window_bounds = array<i64: 8, 16>}, {pipeline_mode = #tpu.pipeline_mode<synchronous>, transform_indices = @transform_14, window_bounds = array<i64: 8, 8>}, {pipeline_mode = #tpu.pipeline_mode<synchronous>, transform_indices = @transform_15, window_bounds = array<i64: 8, 1>}, {transform_indices = @transform_16, window_bounds = array<i64: 8, 128>}]} {
    %c0 = arith.constant 0 : index
    %c0_0 = arith.constant 0 : index
    %0 = vector.load %arg1[%c0, %c0_0] : memref<32x128xf32, #tpu.memory_space<vmem>>, vector<32x128xf32>
    %c0_1 = arith.constant 0 : index
    %c0_2 = arith.constant 0 : index
    %1 = vector.load %arg2[%c0_1, %c0_2] : memref<256x128xf32, #tpu.memory_space<vmem>>, vector<256x128xf32>
    %c0_3 = arith.constant 0 : index
    %c0_4 = arith.constant 0 : index
    %2 = vector.load %arg3[%c0_3, %c0_4] : memref<64x128xf32, #tpu.memory_space<vmem>>, vector<64x128xf32>
    %c0_5 = arith.constant 0 : index
    %c0_6 = arith.constant 0 : index
    %3 = vector.load %arg4[%c0_5, %c0_6] : memref<1x128xi32, #tpu.memory_space<vmem>>, vector<1x128xi32>
    %c0_7 = arith.constant 0 : index
    %c0_8 = arith.constant 0 : index
    %4 = vector.load %arg5[%c0_7, %c0_8] : memref<32x32xf32, #tpu.memory_space<vmem>>, vector<32x32xf32>
    %cst = arith.constant dense<0.000000e+00> : vector<32x128xf32>
    %5 = tpu.matmul %4, %0, %cst {dimension_numbers = #tpu.dot_dimension_numbers<[1], [0], [0], [1], [0, 0, 1, 1], [], []>} : vector<32x32xf32>, vector<32x128xf32>, vector<32x128xf32> -> vector<32x128xf32>
    %6 = vector.extract_strided_slice %1 {offsets = [0, 0], sizes = [32, 128], strides = [1, 1]} : vector<256x128xf32> to vector<32x128xf32>
    %7 = arith.mulf %5, %6 : vector<32x128xf32>
    %cst_9 = arith.constant dense<0.000000e+00> : vector<128xf32>
    %8 = vector.multi_reduction <add>, %7, %cst_9 [0] : vector<32x128xf32> to vector<128xf32>
    %9 = vector.shape_cast %8 : vector<128xf32> to vector<1x128xf32>
    %cst_10 = arith.constant 0.176776692 : f32
    %10 = vector.broadcast %cst_10 : f32 to vector<1x128xf32>
    %11 = arith.mulf %9, %10 : vector<1x128xf32>
    %c0_i32 = arith.constant 0 : i32
    %12 = vector.broadcast %c0_i32 : i32 to vector<1x128xi32>
    %13 = arith.cmpi sgt, %3, %12 : vector<1x128xi32>
    %cst_11 = arith.constant -1.000000e+06 : f32
    %14 = vector.broadcast %cst_11 : f32 to vector<1x128xf32>
    %15 = arith.select %13, %11, %14 : vector<1x128xi1>, vector<1x128xf32>
    %16 = vector.extract_strided_slice %1 {offsets = [32, 0], sizes = [32, 128], strides = [1, 1]} : vector<256x128xf32> to vector<32x128xf32>
    %17 = arith.mulf %5, %16 : vector<32x128xf32>
    %cst_12 = arith.constant dense<0.000000e+00> : vector<128xf32>
    %18 = vector.multi_reduction <add>, %17, %cst_12 [0] : vector<32x128xf32> to vector<128xf32>
    %19 = vector.shape_cast %18 : vector<128xf32> to vector<1x128xf32>
    %cst_13 = arith.constant 0.176776692 : f32
    %20 = vector.broadcast %cst_13 : f32 to vector<1x128xf32>
    %21 = arith.mulf %19, %20 : vector<1x128xf32>
    %c1_i32 = arith.constant 1 : i32
    %22 = vector.broadcast %c1_i32 : i32 to vector<1x128xi32>
    %23 = arith.cmpi sgt, %3, %22 : vector<1x128xi32>
    %cst_14 = arith.constant -1.000000e+06 : f32
    %24 = vector.broadcast %cst_14 : f32 to vector<1x128xf32>
    %25 = arith.select %23, %21, %24 : vector<1x128xi1>, vector<1x128xf32>
    %26 = vector.extract_strided_slice %1 {offsets = [64, 0], sizes = [32, 128], strides = [1, 1]} : vector<256x128xf32> to vector<32x128xf32>
    %27 = arith.mulf %5, %26 : vector<32x128xf32>
    %cst_15 = arith.constant dense<0.000000e+00> : vector<128xf32>
    %28 = vector.multi_reduction <add>, %27, %cst_15 [0] : vector<32x128xf32> to vector<128xf32>
    %29 = vector.shape_cast %28 : vector<128xf32> to vector<1x128xf32>
    %cst_16 = arith.constant 0.176776692 : f32
    %30 = vector.broadcast %cst_16 : f32 to vector<1x128xf32>
    %31 = arith.mulf %29, %30 : vector<1x128xf32>
    %c2_i32 = arith.constant 2 : i32
    %32 = vector.broadcast %c2_i32 : i32 to vector<1x128xi32>
    %33 = arith.cmpi sgt, %3, %32 : vector<1x128xi32>
    %cst_17 = arith.constant -1.000000e+06 : f32
    %34 = vector.broadcast %cst_17 : f32 to vector<1x128xf32>
    %35 = arith.select %33, %31, %34 : vector<1x128xi1>, vector<1x128xf32>
    %36 = vector.extract_strided_slice %1 {offsets = [96, 0], sizes = [32, 128], strides = [1, 1]} : vector<256x128xf32> to vector<32x128xf32>
    %37 = arith.mulf %5, %36 : vector<32x128xf32>
    %cst_18 = arith.constant dense<0.000000e+00> : vector<128xf32>
    %38 = vector.multi_reduction <add>, %37, %cst_18 [0] : vector<32x128xf32> to vector<128xf32>
    %39 = vector.shape_cast %38 : vector<128xf32> to vector<1x128xf32>
    %cst_19 = arith.constant 0.176776692 : f32
    %40 = vector.broadcast %cst_19 : f32 to vector<1x128xf32>
    %41 = arith.mulf %39, %40 : vector<1x128xf32>
    %c3_i32 = arith.constant 3 : i32
    %42 = vector.broadcast %c3_i32 : i32 to vector<1x128xi32>
    %43 = arith.cmpi sgt, %3, %42 : vector<1x128xi32>
    %cst_20 = arith.constant -1.000000e+06 : f32
    %44 = vector.broadcast %cst_20 : f32 to vector<1x128xf32>
    %45 = arith.select %43, %41, %44 : vector<1x128xi1>, vector<1x128xf32>
    %46 = vector.extract_strided_slice %1 {offsets = [128, 0], sizes = [32, 128], strides = [1, 1]} : vector<256x128xf32> to vector<32x128xf32>
    %47 = arith.mulf %5, %46 : vector<32x128xf32>
    %cst_21 = arith.constant dense<0.000000e+00> : vector<128xf32>
    %48 = vector.multi_reduction <add>, %47, %cst_21 [0] : vector<32x128xf32> to vector<128xf32>
    %49 = vector.shape_cast %48 : vector<128xf32> to vector<1x128xf32>
    %cst_22 = arith.constant 0.176776692 : f32
    %50 = vector.broadcast %cst_22 : f32 to vector<1x128xf32>
    %51 = arith.mulf %49, %50 : vector<1x128xf32>
    %c4_i32 = arith.constant 4 : i32
    %52 = vector.broadcast %c4_i32 : i32 to vector<1x128xi32>
    %53 = arith.cmpi sgt, %3, %52 : vector<1x128xi32>
    %cst_23 = arith.constant -1.000000e+06 : f32
    %54 = vector.broadcast %cst_23 : f32 to vector<1x128xf32>
    %55 = arith.select %53, %51, %54 : vector<1x128xi1>, vector<1x128xf32>
    %56 = vector.extract_strided_slice %1 {offsets = [160, 0], sizes = [32, 128], strides = [1, 1]} : vector<256x128xf32> to vector<32x128xf32>
    %57 = arith.mulf %5, %56 : vector<32x128xf32>
    %cst_24 = arith.constant dense<0.000000e+00> : vector<128xf32>
    %58 = vector.multi_reduction <add>, %57, %cst_24 [0] : vector<32x128xf32> to vector<128xf32>
    %59 = vector.shape_cast %58 : vector<128xf32> to vector<1x128xf32>
    %cst_25 = arith.constant 0.176776692 : f32
    %60 = vector.broadcast %cst_25 : f32 to vector<1x128xf32>
    %61 = arith.mulf %59, %60 : vector<1x128xf32>
    %c5_i32 = arith.constant 5 : i32
    %62 = vector.broadcast %c5_i32 : i32 to vector<1x128xi32>
    %63 = arith.cmpi sgt, %3, %62 : vector<1x128xi32>
    %cst_26 = arith.constant -1.000000e+06 : f32
    %64 = vector.broadcast %cst_26 : f32 to vector<1x128xf32>
    %65 = arith.select %63, %61, %64 : vector<1x128xi1>, vector<1x128xf32>
    %66 = vector.extract_strided_slice %1 {offsets = [192, 0], sizes = [32, 128], strides = [1, 1]} : vector<256x128xf32> to vector<32x128xf32>
    %67 = arith.mulf %5, %66 : vector<32x128xf32>
    %cst_27 = arith.constant dense<0.000000e+00> : vector<128xf32>
    %68 = vector.multi_reduction <add>, %67, %cst_27 [0] : vector<32x128xf32> to vector<128xf32>
    %69 = vector.shape_cast %68 : vector<128xf32> to vector<1x128xf32>
    %cst_28 = arith.constant 0.176776692 : f32
    %70 = vector.broadcast %cst_28 : f32 to vector<1x128xf32>
    %71 = arith.mulf %69, %70 : vector<1x128xf32>
    %c6_i32 = arith.constant 6 : i32
    %72 = vector.broadcast %c6_i32 : i32 to vector<1x128xi32>
    %73 = arith.cmpi sgt, %3, %72 : vector<1x128xi32>
    %cst_29 = arith.constant -1.000000e+06 : f32
    %74 = vector.broadcast %cst_29 : f32 to vector<1x128xf32>
    %75 = arith.select %73, %71, %74 : vector<1x128xi1>, vector<1x128xf32>
    %76 = vector.extract_strided_slice %1 {offsets = [224, 0], sizes = [32, 128], strides = [1, 1]} : vector<256x128xf32> to vector<32x128xf32>
    %77 = arith.mulf %5, %76 : vector<32x128xf32>
    %cst_30 = arith.constant dense<0.000000e+00> : vector<128xf32>
    %78 = vector.multi_reduction <add>, %77, %cst_30 [0] : vector<32x128xf32> to vector<128xf32>
    %79 = vector.shape_cast %78 : vector<128xf32> to vector<1x128xf32>
    %cst_31 = arith.constant 0.176776692 : f32
    %80 = vector.broadcast %cst_31 : f32 to vector<1x128xf32>
    %81 = arith.mulf %79, %80 : vector<1x128xf32>
    %c7_i32 = arith.constant 7 : i32
    %82 = vector.broadcast %c7_i32 : i32 to vector<1x128xi32>
    %83 = arith.cmpi sgt, %3, %82 : vector<1x128xi32>
    %cst_32 = arith.constant -1.000000e+06 : f32
    %84 = vector.broadcast %cst_32 : f32 to vector<1x128xf32>
    %85 = arith.select %83, %81, %84 : vector<1x128xi1>, vector<1x128xf32>
    %86 = arith.maximumf %15, %25 : vector<1x128xf32>
    %87 = arith.maximumf %86, %35 : vector<1x128xf32>
    %88 = arith.maximumf %87, %45 : vector<1x128xf32>
    %89 = arith.maximumf %88, %55 : vector<1x128xf32>
    %90 = arith.maximumf %89, %65 : vector<1x128xf32>
    %91 = arith.maximumf %90, %75 : vector<1x128xf32>
    %92 = arith.maximumf %91, %85 : vector<1x128xf32>
    %93 = arith.subf %15, %92 : vector<1x128xf32>
    %94 = math.exp %93 : vector<1x128xf32>
    %95 = arith.subf %25, %92 : vector<1x128xf32>
    %96 = math.exp %95 : vector<1x128xf32>
    %97 = arith.subf %35, %92 : vector<1x128xf32>
    %98 = math.exp %97 : vector<1x128xf32>
    %99 = arith.subf %45, %92 : vector<1x128xf32>
    %100 = math.exp %99 : vector<1x128xf32>
    %101 = arith.subf %55, %92 : vector<1x128xf32>
    %102 = math.exp %101 : vector<1x128xf32>
    %103 = arith.subf %65, %92 : vector<1x128xf32>
    %104 = math.exp %103 : vector<1x128xf32>
    %105 = arith.subf %75, %92 : vector<1x128xf32>
    %106 = math.exp %105 : vector<1x128xf32>
    %107 = arith.subf %85, %92 : vector<1x128xf32>
    %108 = math.exp %107 : vector<1x128xf32>
    %109 = arith.addf %94, %96 : vector<1x128xf32>
    %110 = arith.addf %109, %98 : vector<1x128xf32>
    %111 = arith.addf %110, %100 : vector<1x128xf32>
    %112 = arith.addf %111, %102 : vector<1x128xf32>
    %113 = arith.addf %112, %104 : vector<1x128xf32>
    %114 = arith.addf %113, %106 : vector<1x128xf32>
    %115 = arith.addf %114, %108 : vector<1x128xf32>
    %116 = tpu.reciprocal %115 {approx = true} : vector<1x128xf32> -> vector<1x128xf32>
    %117 = arith.mulf %94, %116 : vector<1x128xf32>
    %118 = vector.extract_strided_slice %1 {offsets = [0, 0], sizes = [32, 128], strides = [1, 1]} : vector<256x128xf32> to vector<32x128xf32>
    %119 = vector.broadcast %117 : vector<1x128xf32> to vector<32x128xf32>
    %120 = arith.mulf %119, %118 : vector<32x128xf32>
    %121 = vector.extract_strided_slice %2 {offsets = [0, 0], sizes = [8, 128], strides = [1, 1]} : vector<64x128xf32> to vector<8x128xf32>
    %122 = vector.broadcast %117 : vector<1x128xf32> to vector<8x128xf32>
    %123 = arith.mulf %122, %121 : vector<8x128xf32>
    %124 = arith.mulf %96, %116 : vector<1x128xf32>
    %125 = vector.extract_strided_slice %1 {offsets = [32, 0], sizes = [32, 128], strides = [1, 1]} : vector<256x128xf32> to vector<32x128xf32>
    %126 = vector.broadcast %124 : vector<1x128xf32> to vector<32x128xf32>
    %127 = arith.mulf %126, %125 : vector<32x128xf32>
    %128 = arith.addf %120, %127 : vector<32x128xf32>
    %129 = vector.extract_strided_slice %2 {offsets = [8, 0], sizes = [8, 128], strides = [1, 1]} : vector<64x128xf32> to vector<8x128xf32>
    %130 = vector.broadcast %124 : vector<1x128xf32> to vector<8x128xf32>
    %131 = arith.mulf %130, %129 : vector<8x128xf32>
    %132 = arith.addf %123, %131 : vector<8x128xf32>
    %133 = arith.mulf %98, %116 : vector<1x128xf32>
    %134 = vector.extract_strided_slice %1 {offsets = [64, 0], sizes = [32, 128], strides = [1, 1]} : vector<256x128xf32> to vector<32x128xf32>
    %135 = vector.broadcast %133 : vector<1x128xf32> to vector<32x128xf32>
    %136 = arith.mulf %135, %134 : vector<32x128xf32>
    %137 = arith.addf %128, %136 : vector<32x128xf32>
    %138 = vector.extract_strided_slice %2 {offsets = [16, 0], sizes = [8, 128], strides = [1, 1]} : vector<64x128xf32> to vector<8x128xf32>
    %139 = vector.broadcast %133 : vector<1x128xf32> to vector<8x128xf32>
    %140 = arith.mulf %139, %138 : vector<8x128xf32>
    %141 = arith.addf %132, %140 : vector<8x128xf32>
    %142 = arith.mulf %100, %116 : vector<1x128xf32>
    %143 = vector.extract_strided_slice %1 {offsets = [96, 0], sizes = [32, 128], strides = [1, 1]} : vector<256x128xf32> to vector<32x128xf32>
    %144 = vector.broadcast %142 : vector<1x128xf32> to vector<32x128xf32>
    %145 = arith.mulf %144, %143 : vector<32x128xf32>
    %146 = arith.addf %137, %145 : vector<32x128xf32>
    %147 = vector.extract_strided_slice %2 {offsets = [24, 0], sizes = [8, 128], strides = [1, 1]} : vector<64x128xf32> to vector<8x128xf32>
    %148 = vector.broadcast %142 : vector<1x128xf32> to vector<8x128xf32>
    %149 = arith.mulf %148, %147 : vector<8x128xf32>
    %150 = arith.addf %141, %149 : vector<8x128xf32>
    %151 = arith.mulf %102, %116 : vector<1x128xf32>
    %152 = vector.extract_strided_slice %1 {offsets = [128, 0], sizes = [32, 128], strides = [1, 1]} : vector<256x128xf32> to vector<32x128xf32>
    %153 = vector.broadcast %151 : vector<1x128xf32> to vector<32x128xf32>
    %154 = arith.mulf %153, %152 : vector<32x128xf32>
    %155 = arith.addf %146, %154 : vector<32x128xf32>
    %156 = vector.extract_strided_slice %2 {offsets = [32, 0], sizes = [8, 128], strides = [1, 1]} : vector<64x128xf32> to vector<8x128xf32>
    %157 = vector.broadcast %151 : vector<1x128xf32> to vector<8x128xf32>
    %158 = arith.mulf %157, %156 : vector<8x128xf32>
    %159 = arith.addf %150, %158 : vector<8x128xf32>
    %160 = arith.mulf %104, %116 : vector<1x128xf32>
    %161 = vector.extract_strided_slice %1 {offsets = [160, 0], sizes = [32, 128], strides = [1, 1]} : vector<256x128xf32> to vector<32x128xf32>
    %162 = vector.broadcast %160 : vector<1x128xf32> to vector<32x128xf32>
    %163 = arith.mulf %162, %161 : vector<32x128xf32>
    %164 = arith.addf %155, %163 : vector<32x128xf32>
    %165 = vector.extract_strided_slice %2 {offsets = [40, 0], sizes = [8, 128], strides = [1, 1]} : vector<64x128xf32> to vector<8x128xf32>
    %166 = vector.broadcast %160 : vector<1x128xf32> to vector<8x128xf32>
    %167 = arith.mulf %166, %165 : vector<8x128xf32>
    %168 = arith.addf %159, %167 : vector<8x128xf32>
    %169 = arith.mulf %106, %116 : vector<1x128xf32>
    %170 = vector.extract_strided_slice %1 {offsets = [192, 0], sizes = [32, 128], strides = [1, 1]} : vector<256x128xf32> to vector<32x128xf32>
    %171 = vector.broadcast %169 : vector<1x128xf32> to vector<32x128xf32>
    %172 = arith.mulf %171, %170 : vector<32x128xf32>
    %173 = arith.addf %164, %172 : vector<32x128xf32>
    %174 = vector.extract_strided_slice %2 {offsets = [48, 0], sizes = [8, 128], strides = [1, 1]} : vector<64x128xf32> to vector<8x128xf32>
    %175 = vector.broadcast %169 : vector<1x128xf32> to vector<8x128xf32>
    %176 = arith.mulf %175, %174 : vector<8x128xf32>
    %177 = arith.addf %168, %176 : vector<8x128xf32>
    %178 = arith.mulf %108, %116 : vector<1x128xf32>
    %179 = vector.extract_strided_slice %1 {offsets = [224, 0], sizes = [32, 128], strides = [1, 1]} : vector<256x128xf32> to vector<32x128xf32>
    %180 = vector.broadcast %178 : vector<1x128xf32> to vector<32x128xf32>
    %181 = arith.mulf %180, %179 : vector<32x128xf32>
    %182 = arith.addf %173, %181 : vector<32x128xf32>
    %183 = vector.extract_strided_slice %2 {offsets = [56, 0], sizes = [8, 128], strides = [1, 1]} : vector<64x128xf32> to vector<8x128xf32>
    %184 = vector.broadcast %178 : vector<1x128xf32> to vector<8x128xf32>
    %185 = arith.mulf %184, %183 : vector<8x128xf32>
    %186 = arith.addf %177, %185 : vector<8x128xf32>
    %187 = tpu.concatenate %0, %182, %186 in 0 : vector<32x128xf32>, vector<32x128xf32>, vector<8x128xf32> -> vector<72x128xf32>
    %188 = vector.extract_strided_slice %187 {offsets = [0, 0], sizes = [64, 128], strides = [1, 1]} : vector<72x128xf32> to vector<64x128xf32>
    %189 = vector.extract_strided_slice %187 {offsets = [8, 0], sizes = [64, 128], strides = [1, 1]} : vector<72x128xf32> to vector<64x128xf32>
    %190 = arith.mulf %188, %189 : vector<64x128xf32>
    %191 = vector.extract_strided_slice %187 {offsets = [0, 0], sizes = [56, 128], strides = [1, 1]} : vector<72x128xf32> to vector<56x128xf32>
    %192 = vector.extract_strided_slice %187 {offsets = [16, 0], sizes = [56, 128], strides = [1, 1]} : vector<72x128xf32> to vector<56x128xf32>
    %193 = arith.mulf %191, %192 : vector<56x128xf32>
    %194 = vector.extract_strided_slice %187 {offsets = [0, 0], sizes = [48, 128], strides = [1, 1]} : vector<72x128xf32> to vector<48x128xf32>
    %195 = vector.extract_strided_slice %187 {offsets = [24, 0], sizes = [48, 128], strides = [1, 1]} : vector<72x128xf32> to vector<48x128xf32>
    %196 = arith.mulf %194, %195 : vector<48x128xf32>
    %197 = vector.extract_strided_slice %187 {offsets = [0, 0], sizes = [40, 128], strides = [1, 1]} : vector<72x128xf32> to vector<40x128xf32>
    %198 = vector.extract_strided_slice %187 {offsets = [32, 0], sizes = [40, 128], strides = [1, 1]} : vector<72x128xf32> to vector<40x128xf32>
    %199 = arith.mulf %197, %198 : vector<40x128xf32>
    %200 = vector.extract_strided_slice %187 {offsets = [0, 0], sizes = [32, 128], strides = [1, 1]} : vector<72x128xf32> to vector<32x128xf32>
    %201 = vector.extract_strided_slice %187 {offsets = [40, 0], sizes = [32, 128], strides = [1, 1]} : vector<72x128xf32> to vector<32x128xf32>
    %202 = arith.mulf %200, %201 : vector<32x128xf32>
    %203 = vector.extract_strided_slice %187 {offsets = [0, 0], sizes = [24, 128], strides = [1, 1]} : vector<72x128xf32> to vector<24x128xf32>
    %204 = vector.extract_strided_slice %187 {offsets = [48, 0], sizes = [24, 128], strides = [1, 1]} : vector<72x128xf32> to vector<24x128xf32>
    %205 = arith.mulf %203, %204 : vector<24x128xf32>
    %206 = vector.extract_strided_slice %187 {offsets = [0, 0], sizes = [16, 128], strides = [1, 1]} : vector<72x128xf32> to vector<16x128xf32>
    %207 = vector.extract_strided_slice %187 {offsets = [56, 0], sizes = [16, 128], strides = [1, 1]} : vector<72x128xf32> to vector<16x128xf32>
    %208 = arith.mulf %206, %207 : vector<16x128xf32>
    %209 = vector.extract_strided_slice %187 {offsets = [0, 0], sizes = [8, 128], strides = [1, 1]} : vector<72x128xf32> to vector<8x128xf32>
    %210 = vector.extract_strided_slice %187 {offsets = [64, 0], sizes = [8, 128], strides = [1, 1]} : vector<72x128xf32> to vector<8x128xf32>
    %211 = arith.mulf %209, %210 : vector<8x128xf32>
    %212 = tpu.concatenate %187, %190, %193, %196, %199, %202, %205, %208, %211 in 0 : vector<72x128xf32>, vector<64x128xf32>, vector<56x128xf32>, vector<48x128xf32>, vector<40x128xf32>, vector<32x128xf32>, vector<24x128xf32>, vector<16x128xf32>, vector<8x128xf32> -> vector<360x128xf32>
    %c0_33 = arith.constant 0 : index
    %c0_34 = arith.constant 0 : index
    %213 = vector.load %arg6[%c0_33, %c0_34] : memref<32x360xf32, #tpu.memory_space<vmem>>, vector<32x360xf32>
    %cst_35 = arith.constant dense<0.000000e+00> : vector<32x128xf32>
    %214 = tpu.matmul %213, %212, %cst_35 {dimension_numbers = #tpu.dot_dimension_numbers<[1], [0], [0], [1], [0, 0, 1, 1], [], []>} : vector<32x360xf32>, vector<360x128xf32>, vector<32x128xf32> -> vector<32x128xf32>
    %c0_36 = arith.constant 0 : index
    %c0_37 = arith.constant 0 : index
    %215 = vector.load %arg7[%c0_36, %c0_37] : memref<32x1xf32, #tpu.memory_space<vmem>>, vector<32x1xf32>
    %216 = vector.broadcast %215 : vector<32x1xf32> to vector<32x128xf32>
    %217 = arith.addf %214, %216 : vector<32x128xf32>
    %218 = tpu.iota {dimensions = array<i32: 1>} : vector<1x128xi32>
    %c128_i32 = arith.constant 128 : i32
    %219 = arith.muli %arg0, %c128_i32 : i32
    %220 = vector.broadcast %219 : i32 to vector<1x128xi32>
    %221 = arith.addi %218, %220 : vector<1x128xi32>
    %c8_i32 = arith.constant 8 : i32
    %222 = vector.broadcast %c8_i32 : i32 to vector<1x128xi32>
    %223 = arith.cmpi slt, %221, %222 : vector<1x128xi32>
    %224 = arith.extui %223 : vector<1x128xi1> to vector<1x128xi32>
    %225 = arith.sitofp %224 : vector<1x128xi32> to vector<1x128xf32>
    %cst_38 = arith.constant dense<0.000000e+00> : vector<1xf32>
    %226 = vector.multi_reduction <add>, %225, %cst_38 [1] : vector<1x128xf32> to vector<1xf32>
    %227 = vector.shape_cast %226 : vector<1xf32> to vector<1x1xf32>
    %cst_39 = arith.constant 1.000000e+00 : f32
    %228 = vector.broadcast %cst_39 : f32 to vector<1x1xf32>
    %229 = arith.maximumf %227, %228 : vector<1x1xf32>
    %cst_40 = arith.constant 1.000000e+00 : f32
    %230 = vector.broadcast %cst_40 : f32 to vector<1x1xf32>
    %231 = arith.divf %230, %229 : vector<1x1xf32>
    %232 = vector.broadcast %225 : vector<1x128xf32> to vector<32x128xf32>
    %233 = arith.mulf %217, %232 : vector<32x128xf32>
    %cst_41 = arith.constant dense<0.000000e+00> : vector<32xf32>
    %234 = vector.multi_reduction <add>, %233, %cst_41 [1] : vector<32x128xf32> to vector<32xf32>
    %235 = vector.shape_cast %234 : vector<32xf32> to vector<32x1xf32>
    %236 = vector.broadcast %231 : vector<1x1xf32> to vector<32x1xf32>
    %237 = arith.mulf %235, %236 : vector<32x1xf32>
    %238 = vector.broadcast %237 : vector<32x1xf32> to vector<32x128xf32>
    %239 = arith.subf %217, %238 : vector<32x128xf32>
    %240 = arith.mulf %239, %239 : vector<32x128xf32>
    %241 = vector.broadcast %225 : vector<1x128xf32> to vector<32x128xf32>
    %242 = arith.mulf %240, %241 : vector<32x128xf32>
    %cst_42 = arith.constant dense<0.000000e+00> : vector<32xf32>
    %243 = vector.multi_reduction <add>, %242, %cst_42 [1] : vector<32x128xf32> to vector<32xf32>
    %244 = vector.shape_cast %243 : vector<32xf32> to vector<32x1xf32>
    %245 = vector.broadcast %231 : vector<1x1xf32> to vector<32x1xf32>
    %246 = arith.mulf %244, %245 : vector<32x1xf32>
    %cst_43 = arith.constant 9.99999974E-6 : f32
    %247 = vector.broadcast %cst_43 : f32 to vector<32x1xf32>
    %248 = arith.addf %246, %247 : vector<32x1xf32>
    %249 = math.rsqrt %248 : vector<32x1xf32>
    %250 = vector.broadcast %249 : vector<32x1xf32> to vector<32x128xf32>
    %251 = arith.mulf %239, %250 : vector<32x128xf32>
    %c0_44 = arith.constant 0 : index
    %c0_45 = arith.constant 0 : index
    %252 = vector.load %arg8[%c0_44, %c0_45] : memref<32x1xf32, #tpu.memory_space<vmem>>, vector<32x1xf32>
    %253 = vector.broadcast %252 : vector<32x1xf32> to vector<32x128xf32>
    %254 = arith.mulf %251, %253 : vector<32x128xf32>
    %c0_46 = arith.constant 0 : index
    %c0_47 = arith.constant 0 : index
    %255 = vector.load %arg9[%c0_46, %c0_47] : memref<32x1xf32, #tpu.memory_space<vmem>>, vector<32x1xf32>
    %256 = vector.broadcast %255 : vector<32x1xf32> to vector<32x128xf32>
    %257 = arith.addf %254, %256 : vector<32x128xf32>
    %cst_48 = arith.constant 0.000000e+00 : f32
    %258 = vector.broadcast %cst_48 : f32 to vector<32x128xf32>
    %259 = arith.maximumf %257, %258 : vector<32x128xf32>
    %c0_49 = arith.constant 0 : index
    %c0_50 = arith.constant 0 : index
    %260 = vector.load %arg10[%c0_49, %c0_50] : memref<16x32xf32, #tpu.memory_space<vmem>>, vector<16x32xf32>
    %cst_51 = arith.constant dense<0.000000e+00> : vector<16x128xf32>
    %261 = tpu.matmul %260, %259, %cst_51 {dimension_numbers = #tpu.dot_dimension_numbers<[1], [0], [0], [1], [0, 0, 1, 1], [], []>} : vector<16x32xf32>, vector<32x128xf32>, vector<16x128xf32> -> vector<16x128xf32>
    %c0_52 = arith.constant 0 : index
    %c0_53 = arith.constant 0 : index
    %262 = vector.load %arg11[%c0_52, %c0_53] : memref<16x1xf32, #tpu.memory_space<vmem>>, vector<16x1xf32>
    %263 = vector.broadcast %262 : vector<16x1xf32> to vector<16x128xf32>
    %264 = arith.addf %261, %263 : vector<16x128xf32>
    %265 = vector.broadcast %225 : vector<1x128xf32> to vector<16x128xf32>
    %266 = arith.mulf %264, %265 : vector<16x128xf32>
    %cst_54 = arith.constant dense<0.000000e+00> : vector<16xf32>
    %267 = vector.multi_reduction <add>, %266, %cst_54 [1] : vector<16x128xf32> to vector<16xf32>
    %268 = vector.shape_cast %267 : vector<16xf32> to vector<16x1xf32>
    %269 = vector.broadcast %231 : vector<1x1xf32> to vector<16x1xf32>
    %270 = arith.mulf %268, %269 : vector<16x1xf32>
    %271 = vector.broadcast %270 : vector<16x1xf32> to vector<16x128xf32>
    %272 = arith.subf %264, %271 : vector<16x128xf32>
    %273 = arith.mulf %272, %272 : vector<16x128xf32>
    %274 = vector.broadcast %225 : vector<1x128xf32> to vector<16x128xf32>
    %275 = arith.mulf %273, %274 : vector<16x128xf32>
    %cst_55 = arith.constant dense<0.000000e+00> : vector<16xf32>
    %276 = vector.multi_reduction <add>, %275, %cst_55 [1] : vector<16x128xf32> to vector<16xf32>
    %277 = vector.shape_cast %276 : vector<16xf32> to vector<16x1xf32>
    %278 = vector.broadcast %231 : vector<1x1xf32> to vector<16x1xf32>
    %279 = arith.mulf %277, %278 : vector<16x1xf32>
    %cst_56 = arith.constant 9.99999974E-6 : f32
    %280 = vector.broadcast %cst_56 : f32 to vector<16x1xf32>
    %281 = arith.addf %279, %280 : vector<16x1xf32>
    %282 = math.rsqrt %281 : vector<16x1xf32>
    %283 = vector.broadcast %282 : vector<16x1xf32> to vector<16x128xf32>
    %284 = arith.mulf %272, %283 : vector<16x128xf32>
    %c0_57 = arith.constant 0 : index
    %c0_58 = arith.constant 0 : index
    %285 = vector.load %arg12[%c0_57, %c0_58] : memref<16x1xf32, #tpu.memory_space<vmem>>, vector<16x1xf32>
    %286 = vector.broadcast %285 : vector<16x1xf32> to vector<16x128xf32>
    %287 = arith.mulf %284, %286 : vector<16x128xf32>
    %c0_59 = arith.constant 0 : index
    %c0_60 = arith.constant 0 : index
    %288 = vector.load %arg13[%c0_59, %c0_60] : memref<16x1xf32, #tpu.memory_space<vmem>>, vector<16x1xf32>
    %289 = vector.broadcast %288 : vector<16x1xf32> to vector<16x128xf32>
    %290 = arith.addf %287, %289 : vector<16x128xf32>
    %cst_61 = arith.constant 0.000000e+00 : f32
    %291 = vector.broadcast %cst_61 : f32 to vector<16x128xf32>
    %292 = arith.maximumf %290, %291 : vector<16x128xf32>
    %c0_62 = arith.constant 0 : index
    %c0_63 = arith.constant 0 : index
    %293 = vector.load %arg14[%c0_62, %c0_63] : memref<8x16xf32, #tpu.memory_space<vmem>>, vector<8x16xf32>
    %cst_64 = arith.constant dense<0.000000e+00> : vector<8x128xf32>
    %294 = tpu.matmul %293, %292, %cst_64 {dimension_numbers = #tpu.dot_dimension_numbers<[1], [0], [0], [1], [0, 0, 1, 1], [], []>} : vector<8x16xf32>, vector<16x128xf32>, vector<8x128xf32> -> vector<8x128xf32>
    %c0_65 = arith.constant 0 : index
    %c0_66 = arith.constant 0 : index
    %295 = vector.load %arg15[%c0_65, %c0_66] : memref<8x8xf32, #tpu.memory_space<vmem>>, vector<8x8xf32>
    %cst_67 = arith.constant dense<0.000000e+00> : vector<8x128xf32>
    %296 = tpu.matmul %295, %186, %cst_67 {dimension_numbers = #tpu.dot_dimension_numbers<[1], [0], [0], [1], [0, 0, 1, 1], [], []>} : vector<8x8xf32>, vector<8x128xf32>, vector<8x128xf32> -> vector<8x128xf32>
    %297 = arith.addf %294, %296 : vector<8x128xf32>
    %c0_68 = arith.constant 0 : index
    %c0_69 = arith.constant 0 : index
    %298 = vector.load %arg16[%c0_68, %c0_69] : memref<8x1xf32, #tpu.memory_space<vmem>>, vector<8x1xf32>
    %299 = vector.broadcast %298 : vector<8x1xf32> to vector<8x128xf32>
    %300 = arith.addf %297, %299 : vector<8x128xf32>
    %c0_70 = arith.constant 0 : index
    %c0_71 = arith.constant 0 : index
    %301 = vector.load %arg17[%c0_70, %c0_71] : memref<8x128xf32, #tpu.memory_space<vmem>>, vector<8x128xf32>
    tpu.vector_store %arg17[%c0_70, %c0_71], %300 {strides = array<i32>} : memref<8x128xf32, #tpu.memory_space<vmem>>, vector<8x128xf32>,
    return
  }
  func.func @transform_0(%arg0: i32) -> (i32, i32) {
    %c0_i32 = arith.constant 0 : i32
    %c0_i32_0 = arith.constant 0 : i32
    return %c0_i32, %arg0 : i32, i32
  }
  func.func @transform_1(%arg0: i32) -> (i32, i32) {
    %c0_i32 = arith.constant 0 : i32
    %c0_i32_0 = arith.constant 0 : i32
    return %c0_i32, %arg0 : i32, i32
  }
  func.func @transform_2(%arg0: i32) -> (i32, i32) {
    %c0_i32 = arith.constant 0 : i32
    %c0_i32_0 = arith.constant 0 : i32
    return %c0_i32, %arg0 : i32, i32
  }
  func.func @transform_3(%arg0: i32) -> (i32, i32) {
    %c0_i32 = arith.constant 0 : i32
    %c0_i32_0 = arith.constant 0 : i32
    return %c0_i32, %arg0 : i32, i32
  }
  func.func @transform_4(%arg0: i32) -> (i32, i32) {
    %c0_i32 = arith.constant 0 : i32
    %c0_i32_0 = arith.constant 0 : i32
    %c0_i32_1 = arith.constant 0 : i32
    return %c0_i32, %c0_i32_0 : i32, i32
  }
  func.func @transform_5(%arg0: i32) -> (i32, i32) {
    %c0_i32 = arith.constant 0 : i32
    %c0_i32_0 = arith.constant 0 : i32
    %c0_i32_1 = arith.constant 0 : i32
    return %c0_i32, %c0_i32_0 : i32, i32
  }
  func.func @transform_6(%arg0: i32) -> (i32, i32) {
    %c0_i32 = arith.constant 0 : i32
    %c0_i32_0 = arith.constant 0 : i32
    %c0_i32_1 = arith.constant 0 : i32
    return %c0_i32, %c0_i32_0 : i32, i32
  }
  func.func @transform_7(%arg0: i32) -> (i32, i32) {
    %c0_i32 = arith.constant 0 : i32
    %c0_i32_0 = arith.constant 0 : i32
    %c0_i32_1 = arith.constant 0 : i32
    return %c0_i32, %c0_i32_0 : i32, i32
  }
  func.func @transform_8(%arg0: i32) -> (i32, i32) {
    %c0_i32 = arith.constant 0 : i32
    %c0_i32_0 = arith.constant 0 : i32
    %c0_i32_1 = arith.constant 0 : i32
    return %c0_i32, %c0_i32_0 : i32, i32
  }
  func.func @transform_9(%arg0: i32) -> (i32, i32) {
    %c0_i32 = arith.constant 0 : i32
    %c0_i32_0 = arith.constant 0 : i32
    %c0_i32_1 = arith.constant 0 : i32
    return %c0_i32, %c0_i32_0 : i32, i32
  }
  func.func @transform_10(%arg0: i32) -> (i32, i32) {
    %c0_i32 = arith.constant 0 : i32
    %c0_i32_0 = arith.constant 0 : i32
    %c0_i32_1 = arith.constant 0 : i32
    return %c0_i32, %c0_i32_0 : i32, i32
  }
  func.func @transform_11(%arg0: i32) -> (i32, i32) {
    %c0_i32 = arith.constant 0 : i32
    %c0_i32_0 = arith.constant 0 : i32
    %c0_i32_1 = arith.constant 0 : i32
    return %c0_i32, %c0_i32_0 : i32, i32
  }
  func.func @transform_12(%arg0: i32) -> (i32, i32) {
    %c0_i32 = arith.constant 0 : i32
    %c0_i32_0 = arith.constant 0 : i32
    %c0_i32_1 = arith.constant 0 : i32
    return %c0_i32, %c0_i32_0 : i32, i32
  }
  func.func @transform_13(%arg0: i32) -> (i32, i32) {
    %c0_i32 = arith.constant 0 : i32
    %c0_i32_0 = arith.constant 0 : i32
    %c0_i32_1 = arith.constant 0 : i32
    return %c0_i32, %c0_i32_0 : i32, i32
  }
  func.func @transform_14(%arg0: i32) -> (i32, i32) {
    %c0_i32 = arith.constant 0 : i32
    %c0_i32_0 = arith.constant 0 : i32
    %c0_i32_1 = arith.constant 0 : i32
    return %c0_i32, %c0_i32_0 : i32, i32
  }
  func.func @transform_15(%arg0: i32) -> (i32, i32) {
    %c0_i32 = arith.constant 0 : i32
    %c0_i32_0 = arith.constant 0 : i32
    %c0_i32_1 = arith.constant 0 : i32
    return %c0_i32, %c0_i32_0 : i32, i32
  }
  func.func @transform_16(%arg0: i32) -> (i32, i32) {
    %c0_i32 = arith.constant 0 : i32
    %c0_i32_0 = arith.constant 0 : i32
    return %c0_i32, %arg0 : i32, i32
  }
}

</mosaic_0001>

<bundles_post_ra>
// kernel: rim_forward.1
= control target key start
LH: loop header
LB: loop body
LE: loop exit
PB: predicated region body
PF: predicated region fallthrough
CT: control target
= control target key end

     0   :  { %vm102_vm0 = vcmask 261120   ;;  %vm570_vm5 = vcmask 850944   ;;  %vm1031_vm11 = vcmask 64512   ;;  %vm1469_vm12 = vmmov 0   ;;  %s2087_s0 = inlined_call_operand.vmem [shape: f32[32,128], index: 0, kind: input, shape index: {}]   ;;  %s2088_s4 = inlined_call_operand.vmem [shape: f32[32,32], index: 4, kind: input, shape index: {}]   ;;  %s2089_s1 = inlined_call_operand.vmem [shape: f32[256,128], index: 1, kind: input, shape index: {}]   ;;  %s2090_s5 = inlined_call_operand.vmem [shape: f32[32,360], index: 5, kind: input, shape index: {}]   ;;  %s2091_s3 = inlined_call_operand.vmem [shape: s32[1,128], index: 3, kind: input, shape index: {}]   ;;  %s2092_s6 = inlined_call_operand.vmem [shape: f32[32,1], index: 6, kind: input, shape index: {}]   ;;  %s2093_s2 = inlined_call_operand.vmem [shape: f32[64,128], index: 2, kind: input, shape index: {}]   ;;  %s2094_s7 = inlined_call_operand.vmem [shape: f32[32,1], index: 7, kind: input, shape index: {}]   ;;  %s2095_s8 = inlined_call_operand.vmem [shape: f32[32,1], index: 8, kind: input, shape index: {}]   ;;  %s2096_s10 = inlined_call_operand.vmem [shape: f32[16,1], index: 10, kind: input, shape index: {}]   ;;  %s2097_s9 = inlined_call_operand.vmem [shape: f32[16,32], index: 9, kind: input, shape index: {}]   ;;  %s2098_s11 = inlined_call_operand.vmem [shape: f32[16,1], index: 11, kind: input, shape index: {}]   ;;  %s2099_s12 = inlined_call_operand.vmem [shape: f32[16,1], index: 12, kind: input, shape index: {}]   ;;  %s2100_s15 = inlined_call_operand.vmem [shape: f32[8,1], index: 15, kind: input, shape index: {}]   ;;  %s2101_s14 = inlined_call_operand.vmem [shape: f32[8,8], index: 14, kind: input, shape index: {}]   ;;  %s2102_s13 = inlined_call_operand.vmem [shape: f32[8,16], index: 13, kind: input, shape index: {}]   ;;  %s2103_s16 = inlined_call_operand.vmem [shape: f32[8,128], index: 16, kind: output, shape index: {}]  }
   0x1   :  { %2127 = sst [smem:[#allocation20_spill]] %s2087_s0  ;;  %v98_v5 = vld [vmem:[%s2088_s4] sm:$0xff]  ;;  %v99_v7 = vld [vmem:[%s2088_s4 + $0x8] sm:$0xff]  ;;  %v100_v8 = vld [vmem:[%s2088_s4 + $0x10] sm:$0xff]  ;;  %vm1105_vm13 = vcmask 130048  }
   0x2   :  { %s2128_s23 = sld [smem:[#allocation20_spill]]  ;;  %1292 = vmatprep.mubr.msk.f32.mxu0 %vm102_vm0, %v98_v5  ;;  %v101_v9 = vld [vmem:[%s2088_s4 + $0x18] sm:$0xff]  ;;  %v1606_v10 = vld [vmem:[%s2089_s1 + $0x8] sm:$0xff]  ;;  %v1646_v18 = vld [vmem:[%s2089_s1] sm:$0xff] }
   0x3   :  { %v1611_v11 = vld [vmem:[%s2089_s1 + $0x28] sm:$0xff]  ;;  %v1651_v19 = vld [vmem:[%s2089_s1 + $0x20] sm:$0xff]  ;;  %v1694_v36 = vld [vmem:[%s2089_s1 + $0x18] sm:$0xff] }
   0x4   :  { %v1616_v12 = vld [vmem:[%s2089_s1 + $0x48] sm:$0xff]  ;;  %v1656_v21 = vld [vmem:[%s2089_s1 + $0x40] sm:$0xff]  ;;  %v1703_v41 = vld [vmem:[%s2089_s1 + $0x38] sm:$0xff] }
   0x5   :  { %v1621_v13 = vld [vmem:[%s2089_s1 + $0x68] sm:$0xff]  ;;  %v1661_v22 = vld [vmem:[%s2089_s1 + $0x60] sm:$0xff]  ;;  %v1708_v42 = vld [vmem:[%s2089_s1 + $0x58] sm:$0xff] }
   0x6   :  { %v1626_v14 = vld [vmem:[%s2089_s1 + $0x88] sm:$0xff]  ;;  %v1666_v23 = vld [vmem:[%s2089_s1 + $0x80] sm:$0xff]  ;;  %v1713_v43 = vld [vmem:[%s2089_s1 + $0x78] sm:$0xff] }
   0x7   :  { %v1631_v15 = vld [vmem:[%s2089_s1 + $0xa8] sm:$0xff]  ;;  %v1675_v28 = vld [vmem:[%s2089_s1 + $0xa0] sm:$0xff]  ;;  %v1722_v48 = vld [vmem:[%s2089_s1 + $0x98] sm:$0xff] }
   0x8   :  { %v1558_v0 = vld [vmem:[%s2128_s23] sm:$0xff]  ;;  %v1563_v1 = vld [vmem:[%s2128_s23 + $0x8] sm:$0xff]  ;;  %v1568_v2 = vld [vmem:[%s2128_s23 + $0x10] sm:$0xff]  ;;  %2135 = vst [vmem:[#allocation8_spill] sm:$0xff] %v1631_v15 }
   0x9   :  { %2129 = vst [vmem:[#allocation2_spill] sm:$0xff] %v1558_v0  ;;  %2130 = vst [vmem:[#allocation3_spill] sm:$0xff] %v1563_v1  ;;  %v1572_v3 = vpack.c.bf16 %v1563_v1, %v1558_v0  ;;  %v1577_v4 = vld [vmem:[%s2128_s23 + $0x18] sm:$0xff]  ;;  %v1636_v16 = vld [vmem:[%s2089_s1 + $0xc8] sm:$0xff] }
   0xa   :  { %2131 = vst [vmem:[#allocation4_spill] sm:$0xff] %v1568_v2  ;;  %2133 = vst [vmem:[#allocation6_spill] sm:$0xff] %v1577_v4  ;;  %v1584_v6 = vpack.c.bf16 %v1577_v4, %v1568_v2  ;;  %v1641_v17 = vld [vmem:[%s2089_s1 + $0xe8] sm:$0xff]  ;;  %v1680_v29 = vld [vmem:[%s2089_s1 + $0xc0] sm:$0xff] }
   0xb   :  { %2132 = vst [vmem:[#allocation5_spill] sm:$0xff] %v1572_v3  ;;  %1354 = vmatprep.subr.bf16.mxu0 %v1572_v3  ;;  %2136 = vst [vmem:[#allocation9_spill] sm:$0xff] %v1636_v16  ;;  %v1685_v30 = vld [vmem:[%s2089_s1 + $0xe0] sm:$0xff]  ;;  %v1727_v49 = vld [vmem:[%s2089_s1 + $0xb8] sm:$0xff] }
   0xc   :  { %2134 = vst [vmem:[#allocation7_spill] sm:$0xff] %v1584_v6  ;;  %1356 = vmatpush3.bf16.msra.mxu0 %v1572_v3  ;;  %2137 = vst [vmem:[#allocation10_spill] sm:$0xff] %v1641_v17  ;;  %v1732_v50 = vld [vmem:[%s2089_s1 + $0xd8] sm:$0xff]  ;;  %v1742_v57 = vld [vmem:[%s2089_s1 + $0x10] sm:$0xff] }
   0xd   :  { %1358 = vmatprep.subr.bf16.mxu0 %v1584_v6  ;;  %2138 = vst [vmem:[#allocation11_spill] sm:$0xff] %v1675_v28  ;;  %2139 = vst [vmem:[#allocation12_spill] sm:$0xff] %v1680_v29  ;;  %v1737_v56 = vld [vmem:[%s2089_s1 + $0xf8] sm:$0xff]  ;;  %v1747_v58 = vld [vmem:[%s2089_s1 + $0x30] sm:$0xff] }
   0xe   :  { %2140 = vst [vmem:[#allocation13_spill] sm:$0xff] %v1685_v30  ;;  %2141 = vst [vmem:[#allocation14_spill] sm:$0xff] %v1722_v48  ;;  %v1752_v5 = vld [vmem:[%s2089_s1 + $0x50] sm:$0xff] }
   0xf   :  { %2142 = vst [vmem:[#allocation15_spill] sm:$0xff] %v1727_v49  ;;  %2143 = vst [vmem:[#allocation16_spill] sm:$0xff] %v1732_v50 }
  0x10   :  { %1360 = vmatpush3.bf16.msra.mxu0 %v1584_v6  ;;  %2144 = vst [vmem:[#allocation17_spill] sm:$0xff] %v1737_v56 }
  0x13   :  { %1293 = vmatmul.mubr.msk.f32.vlgmr.msra.gmra.mrb[0].mxu0 %vm102_vm0, %v99_v7  ;;  %v1757_v7 = vld [vmem:[%s2089_s1 + $0x70] sm:$0xff] }
  0x14   :  { %1295 = vmatprep.mubr.msk.f32.mxu0 %vm102_vm0, %v100_v8  ;;  %v1762_v8 = vld [vmem:[%s2089_s1 + $0x90] sm:$0xff] }
  0x17   :  { %1296 = vmatmul.mubr.msk.f32.gmra.mrb[2].mxu0 %vm102_vm0, %v101_v9 }
  0xe6   :  { %v1294_v20 = vpop.f32.mrb[0].mxu0 }
  0xe7   :  { %v201_v24 = vmul.f32 %v1294_v20, %v1606_v10  ;;  %v217_v25 = vmul.f32 %v1294_v20, %v1611_v11  ;;  %v233_v26 = vmul.f32 %v1294_v20, %v1616_v12  ;;  %v249_v27 = vmul.f32 %v1294_v20, %v1621_v13  ;;  %v181_v31 = vpop.f32.mrb[1].mxu0 }
  0xe8   :  { %v265_v32 = vmul.f32 %v1294_v20, %v1626_v14  ;;  %v281_v33 = vmul.f32 %v1294_v20, %v1631_v15  ;;  %v297_v34 = vmul.f32 %v1294_v20, %v1636_v16  ;;  %v313_v35 = vmul.f32 %v1294_v20, %v1641_v17 }
  0xe9   :  { %v200_v37 = vmul.f32 %v181_v31, %v1646_v18  ;;  %v216_v38 = vmul.f32 %v181_v31, %v1651_v19  ;;  %v232_v39 = vmul.f32 %v181_v31, %v1656_v21  ;;  %v248_v40 = vmul.f32 %v181_v31, %v1661_v22 }
  0xea   :  { %v264_v44 = vmul.f32 %v181_v31, %v1666_v23  ;;  %v280_v45 = vmul.f32 %v181_v31, %v1675_v28  ;;  %v296_v46 = vmul.f32 %v181_v31, %v1680_v29  ;;  %v312_v47 = vmul.f32 %v181_v31, %v1685_v30  ;;  %v1297_v51 = vpop.f32.mrb[2].mxu0  ;;  %v1781_v31 = vld [vmem:[%s2089_s1 + $0xf0] sm:$0xff] }
  0xeb   :  { %v204_v52 = vadd.f32 %v201_v24, %v200_v37  ;;  %v220_v53 = vadd.f32 %v217_v25, %v216_v38  ;;  %v236_v54 = vadd.f32 %v233_v26, %v232_v39  ;;  %v252_v55 = vadd.f32 %v249_v27, %v248_v40  ;;  %v191_v59 = vpop.f32.mrb[3].mxu0  ;;  %v1771_v26 = vld [vmem:[%s2089_s1 + $0xb0] sm:$0xff] }
  0xec   :  { %v268_v60 = vadd.f32 %v265_v32, %v264_v44  ;;  %v284_v61 = vadd.f32 %v281_v33, %v280_v45  ;;  %v300_v62 = vadd.f32 %v297_v34, %v296_v46  ;;  %v316_v63 = vadd.f32 %v313_v35, %v312_v47  ;;  %2145 = vst [vmem:[#allocation18_spill] sm:$0xff] %v1771_v26  ;;  %v1776_v27 = vld [vmem:[%s2089_s1 + $0xd0] sm:$0xff] }
  0xed   :  { %v203_v9 = vmul.f32 %v1297_v51, %v1694_v36  ;;  %v219_v20 = vmul.f32 %v1297_v51, %v1703_v41  ;;  %v235_v24 = vmul.f32 %v1297_v51, %v1708_v42  ;;  %v251_v25 = vmul.f32 %v1297_v51, %v1713_v43  ;;  %2146 = vst [vmem:[#allocation19_spill] sm:$0xff] %v1776_v27 }
  0xee   :  { %v267_v32 = vmul.f32 %v1297_v51, %v1722_v48  ;;  %v283_v33 = vmul.f32 %v1297_v51, %v1727_v49  ;;  %v299_v34 = vmul.f32 %v1297_v51, %v1732_v50  ;;  %v315_v35 = vmul.f32 %v1297_v51, %v1737_v56 }
  0xef   :  { %v202_v37 = vmul.f32 %v191_v59, %v1742_v57  ;;  %v218_v38 = vmul.f32 %v191_v59, %v1747_v58  ;;  %v234_v39 = vmul.f32 %v191_v59, %v1752_v5  ;;  %v250_v40 = vmul.f32 %v191_v59, %v1757_v7 }
  0xf0   :  { %v266_v44 = vmul.f32 %v191_v59, %v1762_v8  ;;  %v282_v45 = vmul.f32 %v191_v59, %v1771_v26  ;;  %v298_v46 = vmul.f32 %v191_v59, %v1776_v27  ;;  %v314_v47 = vmul.f32 %v191_v59, %v1781_v31 }
  0xf1   :  { %v205_v6 = vadd.f32 %v204_v52, %v202_v37  ;;  %v221_v3 = vadd.f32 %v220_v53, %v218_v38  ;;  %v237_v1 = vadd.f32 %v236_v54, %v234_v39  ;;  %v253_v51 = vadd.f32 %v252_v55, %v250_v40 }
  0xf2   :  { %v269_v4 = vadd.f32 %v268_v60, %v266_v44  ;;  %v285_v2 = vadd.f32 %v284_v61, %v282_v45  ;;  %v301_v0 = vadd.f32 %v300_v62, %v298_v46  ;;  %v317_v56 = vadd.f32 %v316_v63, %v314_v47 }
  0xf3   :  { %v206_v50 = vadd.f32 %v205_v6, %v203_v9  ;;  %v222_v17 = vadd.f32 %v221_v3, %v219_v20  ;;  %v238_v30 = vadd.f32 %v237_v1, %v235_v24  ;;  %v254_v16 = vadd.f32 %v253_v51, %v251_v25 }
  0xf4   :  { %v270_v29 = vadd.f32 %v269_v4, %v267_v32  ;;  %v286_v49 = vadd.f32 %v285_v2, %v283_v33  ;;  %v302_v15 = vadd.f32 %v301_v0, %v299_v34  ;;  %v318_v26 = vadd.f32 %v317_v56, %v315_v35  ;;  %v535_v0 = vld [vmem:[%s2090_s5 + $0x8] sm:$0xff] }
  0xf5   :  { %v207_v48 = vrot.slane %v206_v50, 4  ;;  %v223_v27 = vrot.slane %v222_v17, 4  ;;  %v239_v28 = vrot.slane %v238_v30, 4  ;;  %v255_v59 = vrot.slane %v254_v16, 4  ;;  %647 = vmatprep.mubr.f32.mxu1 %v535_v0 }
  0xf6   :  { %v271_v52 = vrot.slane %v270_v29, 4  ;;  %v287_v53 = vrot.slane %v286_v49, 4  ;;  %v303_v54 = vrot.slane %v302_v15, 4  ;;  %v319_v55 = vrot.slane %v318_v26, 4 }
  0xf7   :  { %v208_v60 = vadd.f32 %v207_v48, %v206_v50  ;;  %v224_v61 = vadd.f32 %v223_v27, %v222_v17  ;;  %v240_v62 = vadd.f32 %v239_v28, %v238_v30  ;;  %v256_v63 = vadd.f32 %v255_v59, %v254_v16  ;;  %v1801_v50 = vld [vmem:[%s2091_s3] sm:$0x1] }
  0xf8   :  { %v272_v6 = vadd.f32 %v271_v52, %v270_v29  ;;  %v288_v3 = vadd.f32 %v287_v53, %v286_v49  ;;  %v304_v1 = vadd.f32 %v303_v54, %v302_v15  ;;  %v320_v9 = vadd.f32 %v319_v55, %v318_v26  ;;  %v536_v54 = vld [vmem:[%s2090_s5 + $0x10] sm:$0xff] }
  0xf9   :  { %v209_v2 = vrot.slane %v208_v60, 2  ;;  %v225_v4 = vrot.slane %v224_v61, 2  ;;  %v241_v56 = vrot.slane %v240_v62, 2  ;;  %v257_v20 = vrot.slane %v256_v63, 2  ;;  %1324 = vmatprep.mubr.msk.f32.mxu0 %vm570_vm5, %v536_v54 }
  0xfa   :  { %v273_v24 = vrot.slane %v272_v6, 2  ;;  %v289_v25 = vrot.slane %v288_v3, 2  ;;  %v305_v32 = vrot.slane %v304_v1, 2  ;;  %v321_v48 = vrot.slane %v320_v9, 2 }
  0xfb   :  { %v210_v17 = vadd.f32 %v209_v2, %v208_v60  ;;  %v226_v28 = vadd.f32 %v225_v4, %v224_v61  ;;  %v242_v16 = vadd.f32 %v241_v56, %v240_v62  ;;  %v258_v29 = vadd.f32 %v257_v20, %v256_v63  ;;  %v546_v20 = vld [vmem:[%s2092_s6] sm:$0xff] }
  0xfc   :  { %v274_v30 = vadd.f32 %v273_v24, %v272_v6  ;;  %v290_v15 = vadd.f32 %v289_v25, %v288_v3  ;;  %v306_v49 = vadd.f32 %v305_v32, %v304_v1  ;;  %v322_v38 = vadd.f32 %v321_v48, %v320_v9  ;;  %v548_v24 = vld [vmem:[%s2092_s6 + $0x10] sm:$0xff] }
  0xfd   :  { %v211_v26 = vrot.slane %v210_v17, 1  ;;  %v227_v27 = vrot.slane %v226_v28, 1  ;;  %v243_v33 = vrot.slane %v242_v16, 1  ;;  %v259_v34 = vrot.slane %v258_v29, 1 }
  0xfe   :  { %v275_v35 = vrot.slane %v274_v30, 1  ;;  %v291_v37 = vrot.slane %v290_v15, 1  ;;  %vm214_vm1 = vcmp.gt.s32.totalorder %v1801_v50, 0  ;;  %vm230_vm2 = vcmp.gt.s32.totalorder %v1801_v50, 1 }
  0xff   :  { %v212_v39 = vadd.f32 %v211_v26, %v210_v17  ;;  %v228_v40 = vadd.f32 %v227_v27, %v226_v28  ;;  %v244_v44 = vadd.f32 %v243_v33, %v242_v16  ;;  %v260_v45 = vadd.f32 %v259_v34, %v258_v29  ;;  %v547_v17 = vld [vmem:[%s2092_s6 + $0x8] sm:$0xff]  ;;  %v549_v28 = vld [vmem:[%s2092_s6 + $0x18] sm:$0xff] }
 0x100   :  { %v307_v46 = vrot.slane %v306_v49, 1  ;;  %v276_v52 = vadd.f32 %v275_v35, %v274_v30  ;;  %vm246_vm3 = vcmp.gt.s32.totalorder %v1801_v50, 2  ;;  %v323_v53 = vrot.slane %v322_v38, 1 }
 0x101   :  { %v213_v47 = vmul.f32 0.17677669, %v212_v39  ;;  %v229_v51 = vmul.f32 0.17677669, %v228_v40  ;;  %v245_v59 = vmul.f32 0.17677669, %v244_v44  ;;  %v292_v62 = vadd.f32 %v291_v37, %v290_v15 }
 0x102   :  { %v261_v61 = vmul.f32 0.17677669, %v260_v45  ;;  %vm262_vm4 = vcmp.gt.s32.totalorder %v1801_v50, 3  ;;  %v277_v3 = vmul.f32 0.17677669, %v276_v52  ;;  %v308_v1 = vadd.f32 %v307_v46, %v306_v49 }
 0x103   :  { %v215_v55 = vsel %vm214_vm1, %v213_v47, -1000000.0  ;;  %v231_v60 = vsel %vm230_vm2, %v229_v51, -1000000.0  ;;  %v247_v6 = vsel %vm246_vm3, %v245_v59, -1000000.0  ;;  %v324_v4 = vadd.f32 %v323_v53, %v322_v38 }
 0x104   :  { %v328_v63 = vmax.f32 %v215_v55, %v231_v60  ;;  %vm278_vm6 = vcmp.gt.s32.totalorder %v1801_v50, 4  ;;  %v263_v0 = vsel %vm262_vm4, %v261_v61, -1000000.0  ;;  %v293_v2 = vmul.f32 0.17677669, %v292_v62 }
 0x105   :  { %v1466_v56 = vmov 0   ;;  %vm294_vm7 = vcmp.gt.s32.totalorder %v1801_v50, 5  ;;  %v279_v32 = vsel %vm278_vm6, %v277_v3, -1000000.0  ;;  %v309_v48 = vmul.f32 0.17677669, %v308_v1 }
 0x106   :  { %v329_v9 = vmax.f32 %v328_v63, %v247_v6  ;;  %1432 = vset.pattern.permute.xlu0 %v1466_v56  ;;  %1433 = vset.pattern.permute.xlu1 %v1466_v56  ;;  %vm310_vm8 = vcmp.gt.s32.totalorder %v1801_v50, 6  ;;  %v295_v29 = vsel %vm294_vm7, %v293_v2, -1000000.0  ;;  %v325_v30 = vmul.f32 0.17677669, %v324_v4 }
 0x107   :  { %552 = vperm.xlu0 %1432, %v546_v20   ;;  %562 = vperm.xlu1 %1433, %v548_v24   ;;  %vm326_vm9 = vcmp.gt.s32.totalorder %v1801_v50, 7  ;;  %v311_v49 = vsel %vm310_vm8, %v309_v48, -1000000.0  ;;  %v1467_v4 = vmov 0.0  }
 0x108   :  { %v330_v25 = vmax.f32 %v329_v9, %v263_v0  ;;  %v327_v27 = vsel %vm326_vm9, %v325_v30, -1000000.0 }
 0x10a   :  { %v331_v16 = vmax.f32 %v330_v25, %v279_v32 }
 0x10b   :  { %557 = vperm.xlu0 %1432, %v547_v17   ;;  %567 = vperm.xlu1 %1433, %v549_v28  }
 0x10c   :  { %v332_v15 = vmax.f32 %v331_v16, %v295_v29 }
 0x10e   :  { %v333_v26 = vmax.f32 %v332_v15, %v311_v49 }
 0x110   :  { %v334_v33 = vmax.f32 %v333_v26, %v327_v27 }
 0x112   :  { %v335_v34 = vsub.f32 %v215_v55, %v334_v33  ;;  %v338_v35 = vsub.f32 %v231_v60, %v334_v33  ;;  %v341_v37 = vsub.f32 %v247_v6, %v334_v33  ;;  %v344_v38 = vsub.f32 %v263_v0, %v334_v33 }
 0x113   :  { %v347_v39 = vsub.f32 %v279_v32, %v334_v33  ;;  %v350_v40 = vsub.f32 %v295_v29, %v334_v33  ;;  %v353_v44 = vsub.f32 %v311_v49, %v334_v33  ;;  %v356_v45 = vsub.f32 %v327_v27, %v334_v33 }
 0x114   :  { %v336_v46 = vmul.f32 1.442695, %v335_v34  ;;  %v339_v47 = vmul.f32 1.442695, %v338_v35  ;;  %v342_v51 = vmul.f32 1.442695, %v341_v37  ;;  %v369_v55 = vlaneseq }
 0x115   :  { %v345_v50 = vmul.f32 1.442695, %v344_v38  ;;  %v348_v59 = vmul.f32 1.442695, %v347_v39  ;;  %v351_v52 = vmul.f32 1.442695, %v350_v40 }
 0x116   :  { %1434 = vpow2.f32 %v336_v46  ;;  %v354_v53 = vmul.f32 1.442695, %v353_v44  ;;  %v357_v54 = vmul.f32 1.442695, %v356_v45  ;;  %v754_v62 = vand.u32 127, %v369_v55  ;;  %v89_v37 = vld [vmem:[%s2093_s2] sm:$0xff] }
 0x117   :  { %1436 = vpow2.f32 %v339_v47  ;;  %v370_v28 = vshrl.u32 %v369_v55, 7  ;;  %v90_v44 = vld [vmem:[%s2093_s2 + $0x8] sm:$0xff] }
 0x118   :  { %1438 = vpow2.f32 %v342_v51  ;;  %vm758_vm10 = vcmp.lt.s32.totalorder %v754_v62, 8 }
 0x119   :  { %1440 = vpow2.f32 %v345_v50  ;;  %v1830_v56 = vsel %vm758_vm10, 1.0, %v1467_v4  ;;  %v1833_v16 = vsub.s32 0, %v370_v28 }
 0x11a   :  { %1442 = vpow2.f32 %v348_v59 }
 0x11b   :  { %1444 = vpow2.f32 %v351_v52 }
 0x11c   :  { %1446 = vpow2.f32 %v354_v53 }
 0x11d   :  { %1448 = vpow2.f32 %v357_v54  ;;  %v91_v54 = vld [vmem:[%s2093_s2 + $0x10] sm:$0xff] }
 0x120   :  { %v1435_v60 = vpop.eup %1434 }
 0x121   :  { %v1437_v61 = vpop.eup %1436 }
 0x122   :  { %v359_v63 = vadd.f32 %v1437_v61, %v1435_v60  ;;  %v1439_v6 = vpop.eup %1438 }
 0x123   :  { %v1441_v1 = vpop.eup %1440 }
 0x124   :  { %v360_v3 = vadd.f32 %v1439_v6, %v359_v63  ;;  %v1443_v0 = vpop.eup %1442 }
 0x125   :  { %v1445_v20 = vpop.eup %1444 }
 0x126   :  { %v361_v9 = vadd.f32 %v1441_v1, %v360_v3  ;;  %v1447_v25 = vpop.eup %1446 }
 0x127   :  { %v1449_v48 = vpop.eup %1448 }
 0x128   :  { %v362_v2 = vadd.f32 %v1443_v0, %v361_v9 }
 0x12a   :  { %v363_v24 = vadd.f32 %v1445_v20, %v362_v2  ;;  %761 = vadd.xlane.f32.xlu0 %v1830_v56 }
 0x12c   :  { %v364_v32 = vadd.f32 %v1447_v25, %v363_v24 }
 0x12e   :  { %v365_v17 = vadd.f32 %v1449_v48, %v364_v32  ;;  %v93_v32 = vld [vmem:[%s2093_s2 + $0x20] sm:$0xff] }
 0x130   :  { %1450 = vrcp.f32 %v365_v17 }
 0x13a   :  { %v1451_v29 = vpop.eup %1450 }
 0x13b   :  { %v367_v30 = vmul.f32 %v1451_v29, %v1435_v60  ;;  %v379_v15 = vmul.f32 %v1451_v29, %v1437_v61  ;;  %v396_v49 = vmul.f32 %v1451_v29, %v1439_v6  ;;  %v413_v26 = vmul.f32 %v1451_v29, %v1441_v1 }
 0x13c   :  { %v430_v27 = vmul.f32 %v1451_v29, %v1443_v0  ;;  %v447_v33 = vmul.f32 %v1451_v29, %v1445_v20  ;;  %v464_v34 = vmul.f32 %v1451_v29, %v1447_v25  ;;  %v481_v35 = vmul.f32 %v1451_v29, %v1449_v48 }
 0x13d   :  { %v372_v38 = vrot.slane %v367_v30, %v1833_v16  ;;  %v384_v39 = vrot.slane %v379_v15, %v1833_v16  ;;  %v401_v40 = vrot.slane %v396_v49, %v1833_v16  ;;  %v418_v45 = vrot.slane %v413_v26, %v1833_v16 }
 0x13e   :  { %v435_v46 = vrot.slane %v430_v27, %v1833_v16  ;;  %v452_v47 = vrot.slane %v447_v33, %v1833_v16  ;;  %v1848_v51 = vrot.slane %v464_v34, %v1833_v16  ;;  %v486_v27 = vrot.slane %v481_v35, %v1833_v16  ;;  %v96_v35 = vld [vmem:[%s2093_s2 + $0x38] sm:$0xff] }
 0x13f   :  { %v374_v50 = vmul.f32 %v372_v38, %v1646_v18  ;;  %v375_v59 = vmul.f32 %v372_v38, %v1606_v10  ;;  %v376_v52 = vmul.f32 %v372_v38, %v1742_v57  ;;  %v377_v53 = vmul.f32 %v372_v38, %v1694_v36 }
 0x140   :  { %v378_v55 = vmul.f32 %v372_v38, %v89_v37  ;;  %v386_v60 = vmul.f32 %v384_v39, %v1651_v19  ;;  %v387_v61 = vmul.f32 %v384_v39, %v1611_v11  ;;  %v388_v62 = vmul.f32 %v384_v39, %v1747_v58  ;;  %v92_v19 = vld [vmem:[%s2093_s2 + $0x18] sm:$0xff]  ;;  %v2147_v37 = vld [vmem:[#allocation11_spill] sm:$0xff]  ;;  %v2148_v38 = vld [vmem:[#allocation14_spill] sm:$0xff] }
 0x141   :  { %v389_v63 = vmul.f32 %v384_v39, %v1703_v41  ;;  %v394_v18 = vmul.f32 %v384_v39, %v90_v44  ;;  %v403_v10 = vmul.f32 %v401_v40, %v1656_v21  ;;  %v404_v57 = vmul.f32 %v401_v40, %v1616_v12  ;;  %v2149_v39 = vld [vmem:[#allocation8_spill] sm:$0xff]  ;;  %v2150_v44 = vld [vmem:[#allocation18_spill] sm:$0xff] }
 0x142   :  { %v390_v6 = vadd.f32 %v386_v60, %v374_v50  ;;  %v391_v36 = vadd.f32 %v387_v61, %v375_v59  ;;  %v392_v3 = vadd.f32 %v388_v62, %v376_v52  ;;  %v405_v1 = vmul.f32 %v401_v40, %v1752_v5  ;;  %v2151_v59 = vld [vmem:[#allocation15_spill] sm:$0xff]  ;;  %v2152_v60 = vld [vmem:[#allocation12_spill] sm:$0xff] }
 0x143   :  { %v393_v9 = vadd.f32 %v389_v63, %v377_v53  ;;  %v395_v11 = vadd.f32 %v394_v18, %v378_v55  ;;  %v406_v58 = vmul.f32 %v401_v40, %v1708_v42  ;;  %v411_v0 = vmul.f32 %v401_v40, %v91_v54  ;;  %v2153_v62 = vld [vmem:[#allocation19_spill] sm:$0xff]  ;;  %v2154_v18 = vld [vmem:[#allocation9_spill] sm:$0xff] }
 0x144   :  { %v407_v41 = vadd.f32 %v403_v10, %v390_v6  ;;  %v408_v2 = vadd.f32 %v404_v57, %v391_v36  ;;  %v409_v20 = vadd.f32 %v405_v1, %v392_v3  ;;  %v420_v21 = vmul.f32 %v418_v45, %v1661_v22  ;;  %v2155_v6 = vld [vmem:[#allocation13_spill] sm:$0xff]  ;;  %v2156_v3 = vld [vmem:[#allocation10_spill] sm:$0xff] }
 0x145   :  { %v410_v12 = vadd.f32 %v406_v58, %v393_v9  ;;  %v412_v24 = vadd.f32 %v411_v0, %v395_v11  ;;  %v421_v25 = vmul.f32 %v418_v45, %v1621_v13  ;;  %v422_v5 = vmul.f32 %v418_v45, %v1757_v7  ;;  %v94_v13 = vld [vmem:[%s2093_s2 + $0x28] sm:$0xff] }
 0x146   :  { %v423_v48 = vmul.f32 %v418_v45, %v1713_v43  ;;  %v424_v17 = vadd.f32 %v420_v21, %v407_v41  ;;  %v428_v42 = vmul.f32 %v418_v45, %v92_v19  ;;  %v437_v28 = vmul.f32 %v435_v46, %v1666_v23  ;;  %v2157_v21 = vld [vmem:[#allocation16_spill] sm:$0xff] }
 0x147   :  { %v425_v29 = vadd.f32 %v421_v25, %v408_v2  ;;  %v426_v30 = vadd.f32 %v422_v5, %v409_v20  ;;  %v438_v22 = vmul.f32 %v435_v46, %v1626_v14  ;;  %v439_v15 = vmul.f32 %v435_v46, %v1762_v8  ;;  %v95_v14 = vld [vmem:[%s2093_s2 + $0x30] sm:$0xff] }
 0x148   :  { %v427_v7 = vadd.f32 %v423_v48, %v410_v12  ;;  %v429_v49 = vadd.f32 %v428_v42, %v412_v24  ;;  %v441_v26 = vadd.f32 %v437_v28, %v424_v17  ;;  %v445_v34 = vmul.f32 %v435_v46, %v93_v32  ;;  %v2158_v48 = vld [vmem:[#allocation17_spill] sm:$0xff]  ;;  %v2159_v42 = vld [vmem:[#allocation2_spill] sm:$0xff] }
 0x149   :  { %v442_v43 = vadd.f32 %v438_v22, %v425_v29  ;;  %v443_v33 = vadd.f32 %v439_v15, %v426_v30  ;;  %v454_v23 = vmul.f32 %v452_v47, %v2147_v37  ;;  %v440_v8 = vmul.f32 %v435_v46, %v2148_v38  ;;  %v2161_v15 = vld [vmem:[#allocation6_spill] sm:$0xff] }
 0x14a   :  { %v455_v40 = vmul.f32 %v452_v47, %v2149_v39  ;;  %v456_v45 = vmul.f32 %v452_v47, %v2150_v44  ;;  %v446_v50 = vadd.f32 %v445_v34, %v429_v49  ;;  %v457_v52 = vmul.f32 %v452_v47, %v2151_v59  ;;  %v2162_v49 = vld [vmem:[#allocation3_spill] sm:$0xff] }
 0x14b   :  { %v458_v53 = vadd.f32 %v454_v23, %v441_v26  ;;  %v462_v16 = vmul.f32 %v452_v47, %v94_v13  ;;  %v471_v61 = vmul.f32 %v1848_v51, %v2152_v60  ;;  %v473_v46 = vmul.f32 %v1848_v51, %v2153_v62 }
 0x14c   :  { %v459_v54 = vadd.f32 %v455_v40, %v442_v43  ;;  %v460_v55 = vadd.f32 %v456_v45, %v443_v33  ;;  %v472_v10 = vmul.f32 %v1848_v51, %v2154_v18  ;;  %v479_v57 = vmul.f32 %v1848_v51, %v95_v14 }
 0x14d   :  { %v463_v63 = vadd.f32 %v462_v16, %v446_v50  ;;  %v488_v47 = vmul.f32 %v486_v27, %v2155_v6  ;;  %v489_v1 = vmul.f32 %v486_v27, %v2156_v3  ;;  %v490_v19 = vmul.f32 %v486_v27, %v1781_v31  ;;  %v2160_v31 = vld [vmem:[#allocation4_spill] sm:$0xff] }
 0x14e   :  { %v477_v36 = vadd.f32 %v473_v46, %v460_v55  ;;  %v444_v9 = vadd.f32 %v440_v8, %v427_v7  ;;  %v496_v58 = vmul.f32 %v486_v27, %v96_v35  ;;  %v475_v0 = vadd.f32 %v471_v61, %v458_v53  ;;  %v2163_v35 = vld [vmem:[#allocation5_spill] sm:$0xff] }
 0x14f   :  { %v480_v11 = vadd.f32 %v479_v57, %v463_v63  ;;  %v476_v41 = vadd.f32 %v472_v10, %v459_v54  ;;  %v474_v12 = vmul.f32 %v1848_v51, %v2157_v21  ;;  %v491_v17 = vmul.f32 %v486_v27, %v2158_v48 }
 0x150   :  { %v1903_v2 = vadd.f32 %v490_v19, %v477_v36  ;;  %v461_v20 = vadd.f32 %v457_v52, %v444_v9  ;;  %v492_v25 = vadd.f32 %v488_v47, %v475_v0  ;;  %v506_v28 = vmul.f32 %v2160_v31, %v2159_v42  ;;  %v2164_v36 = vld [vmem:[#allocation7_spill] sm:$0xff] }
 0x151   :  { %v1907_v24 = vadd.f32 %v496_v58, %v480_v11  ;;  %v493_v5 = vadd.f32 %v489_v1, %v476_v41  ;;  %v507_v27 = vmul.f32 %v2161_v15, %v2162_v49  ;;  %v513_v9 = vmul.f32 %v2161_v15, %v2159_v42 }
 0x152   :  { %v478_v32 = vadd.f32 %v474_v12, %v461_v20  ;;  %v521_v29 = vmul.f32 %v1903_v2, %v2160_v31  ;;  %v510_v7 = vmul.f32 %v1903_v2, %v492_v25  ;;  %v525_v26 = vmul.f32 %v1903_v2, %v2162_v49 }
 0x153   :  { %v523_v30 = vmul.f32 %v1907_v24, %v492_v25  ;;  %v524_v22 = vmul.f32 %v493_v5, %v2159_v42  ;;  %v509_v13 = vmul.f32 %v493_v5, %v2161_v15  ;;  %v1371_v43 = vpack.c.bf16 %v493_v5, %v492_v25 }
 0x154   :  { %v495_v51 = vadd.f32 %v491_v17, %v478_v32  ;;  %v508_v33 = vmul.f32 %v492_v25, %v2160_v31  ;;  %v512_v37 = vmul.f32 %v1907_v24, %v1903_v2  ;;  %v515_v52 = vmul.f32 %v493_v5, %v2160_v31 }
 0x155   :  { %v1397_v34 = vpack.c.bf16 %v524_v22, %v523_v30  ;;  %v1369_v38 = vpack.c.bf16 %v510_v7, %v509_v13  ;;  %v516_v16 = vmul.f32 %v1903_v2, %v2161_v15  ;;  %v518_v55 = vmul.f32 %v1907_v24, %v493_v5  ;;  %v542_v30 = vld [vmem:[%s2090_s5 + $0x40] sm:$0xff]  ;;  %v537_v13 = vld [vmem:[%s2090_s5 + $0x18] sm:$0xff]  ;;  %v540_v7 = vld [vmem:[%s2090_s5 + $0x30] sm:$0xff] }
 0x156   :  { %v505_v23 = vmul.f32 %v1907_v24, %v495_v51  ;;  %v522_v14 = vmul.f32 %v495_v51, %v2161_v15  ;;  %v526_v8 = vmul.f32 %v495_v51, %v2160_v31  ;;  %v511_v39 = vmul.f32 %v495_v51, %v493_v5  ;;  %v534_v22 = vld [vmem:[%s2090_s5] sm:$0xff] }
 0x157   :  { %v1375_v40 = vpack.c.bf16 %v495_v51, %v1903_v2  ;;  %v1365_v53 = vpack.c.bf16 %v508_v33, %v507_v27  ;;  %v517_v54 = vmul.f32 %v495_v51, %v492_v25  ;;  %v528_v60 = vmul.f32 %v1903_v2, %v2159_v42 }
 0x158   :  { %v1361_v44 = vpack.c.bf16 %v506_v28, %v505_v23  ;;  %v1393_v45 = vpack.c.bf16 %v522_v14, %v521_v29  ;;  %v1401_v50 = vpack.c.bf16 %v526_v8, %v525_v26  ;;  %v1373_v59 = vpack.c.bf16 %v512_v37, %v511_v39  ;;  %v543_v26 = vld [vmem:[%s2090_s5 + $0x48] sm:$0xff] }
 0x159   :  { %v1381_v61 = vpack.c.bf16 %v516_v16, %v515_v52  ;;  %v1385_v62 = vpack.c.bf16 %v518_v55, %v517_v54  ;;  %v501_v46 = vmul.f32 %v492_v25, %v2161_v15  ;;  %v502_v63 = vmul.f32 %v493_v5, %v492_v25 }
 0x15a   :  { %1362 = vmatprep.subr.bf16.mxu1 %v1361_v44  ;;  %1394 = vmatprep.subr.bf16.mxu0 %v1393_v45  ;;  %v519_v18 = vmul.f32 %v492_v25, %v2159_v42  ;;  %v527_v10 = vmul.f32 %v1907_v24, %v2161_v15  ;;  %v520_v57 = vmul.f32 %v493_v5, %v2162_v49 }
 0x15b   :  { %1364 = vmatpush3.bf16.msra.mxu1 %v2163_v35  ;;  %1396 = vmatpush3.bf16.msra.mxu0 %v1393_v45  ;;  %v503_v6 = vmul.f32 %v1903_v2, %v493_v5  ;;  %v504_v47 = vmul.f32 %v495_v51, %v1903_v2  ;;  %v1387_v3 = vpack.c.bf16 %v502_v63, %v501_v46 }
 0x15c   :  { %1366 = vmatprep.subr.bf16.mxu1 %v1365_v53  ;;  %1398 = vmatprep.subr.bf16.mxu0 %v1397_v34  ;;  %v1389_v1 = vpack.c.bf16 %v520_v57, %v519_v18  ;;  %v1405_v11 = vpack.c.bf16 %v528_v60, %v527_v10  ;;  %v514_v58 = vmul.f32 %v492_v25, %v2162_v49 }
 0x15d   :  { %v1391_v19 = vpack.c.bf16 %v504_v47, %v503_v6  ;;  %v529_v0 = vmul.f32 %v495_v51, %v2162_v49  ;;  %v530_v41 = vmul.f32 %v1907_v24, %v2160_v31  ;;  %v498_v2 = vmul.f32 %v2162_v49, %v2159_v42 }
 0x15e   :  { %v1377_v20 = vpack.c.bf16 %v514_v58, %v513_v9  ;;  %v531_v12 = vmul.f32 %v495_v51, %v2159_v42  ;;  %v532_v5 = vmul.f32 %v1907_v24, %v2162_v49  ;;  %v499_v25 = vmul.f32 %v2160_v31, %v2162_v49  ;;  %v541_v51 = vld [vmem:[%s2090_s5 + $0x38] sm:$0xff]  ;;  %v544_v49 = vld [vmem:[%s2090_s5 + $0x50] sm:$0xff]  ;;  %v847_v9 = vld [vmem:[%s2095_s8 + $0x8] sm:$0xff] }
 0x15f   :  { %1368 = vmatpush3.bf16.msra.mxu1 %v2164_v36  ;;  %1400 = vmatpush3.bf16.msra.mxu0 %v1397_v34  ;;  %v1409_v21 = vpack.c.bf16 %v530_v41, %v529_v0  ;;  %v500_v32 = vmul.f32 %v2161_v15, %v2160_v31  ;;  %v1379_v48 = vpack.c.bf16 %v498_v2, %v1907_v24  ;;  %v539_v31 = vld [vmem:[%s2090_s5 + $0x28] sm:$0xff]  ;;  %v538_v15 = vld [vmem:[%s2090_s5 + $0x20] sm:$0xff]  ;;  %v821_v58 = vld [vmem:[%s2094_s7 + $0x18] sm:$0xff] }
 0x160   :  { %1370 = vmatprep.subr.bf16.mxu1 %v1369_v38  ;;  %1402 = vmatprep.subr.bf16.mxu0 %v1401_v50  ;;  %v1413_v17 = vpack.c.bf16 %v532_v5, %v531_v12  ;;  %v533_v29 = vmul.f32 %v1907_v24, %v2159_v42  ;;  %v545_v42 = vld [vmem:[%s2090_s5 + $0x58] sm:$0xff] }
 0x161   :  { %v1383_v28 = vpack.c.bf16 %v500_v32, %v499_v25 }
 0x163   :  { %1372 = vmatpush3.bf16.msra.mxu1 %v1371_v43  ;;  %1404 = vmatpush3.bf16.msra.mxu0 %v1401_v50 }
 0x164   :  { %1374 = vmatprep.subr.bf16.mxu1 %v1373_v59  ;;  %1406 = vmatprep.subr.bf16.mxu0 %v1405_v11 }
 0x167   :  { %1376 = vmatpush3.bf16.msra.mxu1 %v1375_v40  ;;  %1408 = vmatpush3.bf16.msra.mxu0 %v1405_v11  ;;  %v820_v11 = vld [vmem:[%s2094_s7 + $0x10] sm:$0xff] }
 0x168   :  { %1378 = vmatprep.subr.bf16.mxu1 %v1377_v20  ;;  %1410 = vmatprep.subr.bf16.mxu0 %v1409_v21 }
 0x16b   :  { %1380 = vmatpush3.bf16.msra.mxu1 %v1379_v48  ;;  %1412 = vmatpush3.bf16.msra.mxu0 %v1409_v21 }
 0x16c   :  { %1382 = vmatprep.subr.bf16.mxu1 %v1381_v61  ;;  %1414 = vmatprep.subr.bf16.mxu0 %v1413_v17 }
 0x16f   :  { %1384 = vmatpush3.bf16.msra.mxu1 %v1383_v28  ;;  %1416 = vmatpush3.bf16.msra.mxu0 %v1413_v17 }
 0x170   :  { %1386 = vmatprep.subr.bf16.mxu1 %v1385_v62  ;;  %1322 = vmatprep.subr.mxu0 %v533_v29 }
 0x173   :  { %1388 = vmatpush3.bf16.msra.mxu1 %v1387_v3  ;;  %1323 = vmatpush3.msra.mxu0 %v533_v29  ;;  %v819_v3 = vld [vmem:[%s2094_s7 + $0x8] sm:$0xff] }
 0x174   :  { %1390 = vmatprep.subr.bf16.mxu1 %v1389_v1  ;;  %1325 = vmatmul.mubr.msk.f32.vlgmr.msra.gmra.mrb[4].mxu0 %vm570_vm5, %v539_v31  ;;  %v818_v1 = vld [vmem:[%s2094_s7] sm:$0xff] }
 0x175   :  { %1327 = vmatprep.mubr.msk.f32.mxu0 %vm570_vm5, %v542_v30 }
 0x177   :  { %1392 = vmatpush3.bf16.msra.mxu1 %v1391_v19  ;;  %v846_v19 = vld [vmem:[%s2095_s8] sm:$0xff] }
 0x178   :  { %1328 = vmatmul.mubr.msk.f32.gmra.mrb[6].mxu0 %vm570_vm5, %v545_v42 }
 0x17a   :  { %648 = vmatmul.mubr.f32.vlgmr.msra.gmra.mrb[0].mxu1 %v534_v22 }
 0x17b   :  { %652 = vmatprep.mubr.f32.mxu1 %v538_v15 }
 0x17e   :  { %653 = vmatmul.mubr.f32.gmra.mrb[2].mxu1 %v537_v13 }
 0x17f   :  { %657 = vmatprep.mubr.f32.mxu1 %v541_v51 }
 0x182   :  { %658 = vmatmul.mubr.f32.gmra.mrb[4].mxu1 %v540_v7 }
 0x183   :  { %662 = vmatprep.mubr.f32.mxu1 %v544_v49 }
 0x186   :  { %663 = vmatmul.mubr.f32.gmra.mrb[6].mxu1 %v543_v26  ;;  %v553_v34 = vpop.permute.xlu0 %552  ;;  %v563_v16 = vpop.permute.xlu1 %562 }
 0x187   :  { %1350 = vmatprep.mubr.msk.f32.mxu1 %vm1469_vm12, %v1467_v4 }
 0x18a   :  { %v558_v44 = vpop.permute.xlu0 %557  ;;  %v568_v10 = vpop.permute.xlu1 %567 }
 0x1b7   :  { %v762_v0 = vpop.xlane.xlu0 %761 }
 0x1b8   :  { %v763_v41 = vmax.f32 %v762_v0, 1.0 }
 0x1ba   :  { %1452 = vrcp.f32 %v763_v41 }
 0x1c4   :  { %v2017_v2 = vpop.eup %1452 }
 0x247   :  { %v1326_v43 = vpop.f32.mrb[4].mxu0 }
 0x248   :  { %v734_v27 = vpop.f32.mrb[5].mxu0 }
 0x24b   :  { %v1329_v33 = vpop.f32.mrb[6].mxu0 }
 0x24c   :  { %v744_v37 = vpop.f32.mrb[7].mxu0 }
 0x24d   :  { %v1244_v23 = vpop.f32.mrb[0].mxu1 }
 0x24e   :  { %v1245_v14 = vpop.f32.mrb[1].mxu1 }
 0x24f   :  { %v1246_v38 = vadd.f32 %v1245_v14, %v1244_v23 }
 0x251   :  { %v650_v8 = vadd.f32 %v1246_v38, %v553_v34  ;;  %v1247_v39 = vpop.f32.mrb[2].mxu1  ;;  %v881_v34 = vld [vmem:[%s2096_s10 + $0x8] sm:$0xff] }
 0x252   :  { %v1248_v40 = vpop.f32.mrb[3].mxu1 }
 0x253   :  { %v1249_v45 = vadd.f32 %v1248_v40, %v1247_v39  ;;  %v735_v50 = vadd.f32 %v734_v27, %v650_v8  ;;  %v849_v27 = vld [vmem:[%s2095_s8 + $0x18] sm:$0xff] }
 0x255   :  { %v655_v59 = vadd.f32 %v1249_v45, %v558_v44  ;;  %v1250_v52 = vpop.f32.mrb[4].mxu1  ;;  %v766_v53 = vmul.f32 %v1830_v56, %v735_v50 }
 0x256   :  { %v1251_v35 = vpop.f32.mrb[5].mxu1 }
 0x257   :  { %v740_v54 = vadd.f32 %v1326_v43, %v655_v59  ;;  %v1252_v55 = vadd.f32 %v1251_v35, %v1250_v52  ;;  %770 = vadd.xlane.f32.xlu1 %v766_v53  ;;  %v848_v43 = vld [vmem:[%s2095_s8 + $0x10] sm:$0xff] }
 0x259   :  { %v1253_v60 = vpop.f32.mrb[6].mxu1  ;;  %v660_v61 = vadd.f32 %v1252_v55, %v563_v16  ;;  %v767_v62 = vmul.f32 %v1830_v56, %v740_v54 }
 0x25a   :  { %v1254_v46 = vpop.f32.mrb[7].mxu1 }
 0x25b   :  { %v1255_v63 = vadd.f32 %v1254_v46, %v1253_v60  ;;  %v745_v18 = vadd.f32 %v744_v37, %v660_v61  ;;  %772 = vadd.xlane.f32.xlu0 %v767_v62  ;;  %v878_v37 = vld [vmem:[%s2097_s9] sm:$0xff] }
 0x25c   :  { %1338 = vmatprep.mubr.msk.f32.mxu0 %vm102_vm0, %v878_v37 }
 0x25d   :  { %v665_v57 = vadd.f32 %v1255_v63, %v568_v10  ;;  %v768_v6 = vmul.f32 %v1830_v56, %v745_v18 }
 0x25f   :  { %774 = vadd.xlane.f32.xlu0 %v768_v6  ;;  %v750_v47 = vadd.f32 %v1329_v33, %v665_v57  ;;  %v880_v33 = vld [vmem:[%s2096_s10] sm:$0xff] }
 0x261   :  { %v769_v36 = vmul.f32 %v1830_v56, %v750_v47 }
 0x263   :  { %776 = vadd.xlane.f32.xlu1 %v769_v36 }
 0x274   :  { %829 = vperm.xlu1 %1433, %v819_v3  }
 0x275   :  { %824 = vperm.xlu0 %1432, %v818_v1  }
 0x278   :  { %852 = vperm.xlu1 %1433, %v846_v19  }
 0x279   :  { %857 = vperm.xlu0 %1432, %v847_v9  }
 0x27c   :  { %834 = vperm.xlu1 %1433, %v820_v11  }
 0x27d   :  { %839 = vperm.xlu0 %1432, %v821_v58  }
 0x2e4   :  { %v771_v20 = vpop.xlane.xlu1 %770 }
 0x2e5   :  { %v778_v21 = vmul.f32 %v2017_v2, %v771_v20 }
 0x2e7   :  { %v782_v12 = vsub.f32 %v735_v50, %v778_v21 }
 0x2e8   :  { %v773_v5 = vpop.xlane.xlu0 %772 }
 0x2e9   :  { %v779_v25 = vmul.f32 %v2017_v2, %v773_v5  ;;  %v786_v32 = vmul.f32 %v782_v12, %v782_v12 }
 0x2eb   :  { %v783_v48 = vsub.f32 %v740_v54, %v779_v25  ;;  %v790_v17 = vmul.f32 %v1830_v56, %v786_v32 }
 0x2ec   :  { %v775_v28 = vpop.xlane.xlu0 %774 }
 0x2ed   :  { %v780_v29 = vmul.f32 %v2017_v2, %v775_v28  ;;  %794 = vadd.xlane.f32.xlu0 %v790_v17  ;;  %v787_v31 = vmul.f32 %v783_v48, %v783_v48  ;;  %v879_v17 = vld [vmem:[%s2097_s9 + $0x8] sm:$0xff] }
 0x2ef   :  { %v784_v30 = vsub.f32 %v745_v18, %v780_v29  ;;  %v791_v42 = vmul.f32 %v1830_v56, %v787_v31 }
 0x2f0   :  { %v777_v22 = vpop.xlane.xlu1 %776 }
 0x2f1   :  { %v781_v15 = vmul.f32 %v2017_v2, %v777_v22  ;;  %796 = vadd.xlane.f32.xlu1 %v791_v42  ;;  %v788_v13 = vmul.f32 %v784_v30, %v784_v30 }
 0x2f3   :  { %v785_v51 = vsub.f32 %v750_v47, %v781_v15  ;;  %v792_v7 = vmul.f32 %v1830_v56, %v788_v13 }
 0x2f4   :  { %v825_v23 = vpop.permute.xlu0 %824  ;;  %v830_v14 = vpop.permute.xlu1 %829 }
 0x2f5   :  { %798 = vadd.xlane.f32.xlu0 %v792_v7  ;;  %v789_v49 = vmul.f32 %v785_v51, %v785_v51 }
 0x2f7   :  { %v793_v26 = vmul.f32 %v1830_v56, %v789_v49 }
 0x2f8   :  { %v858_v38 = vpop.permute.xlu0 %857  ;;  %v853_v8 = vpop.permute.xlu1 %852 }
 0x2f9   :  { %800 = vadd.xlane.f32.xlu1 %v793_v26 }
 0x2fc   :  { %v840_v39 = vpop.permute.xlu0 %839  ;;  %v835_v40 = vpop.permute.xlu1 %834 }
 0x30a   :  { %862 = vperm.xlu1 %1433, %v848_v43  }
 0x30b   :  { %867 = vperm.xlu0 %1432, %v849_v27  }
 0x30e   :  { %884 = vperm.xlu1 %1433, %v880_v33  }
 0x30f   :  { %889 = vperm.xlu0 %1432, %v881_v34  }
 0x37a   :  { %v795_v44 = vpop.xlane.xlu0 %794 }
 0x37b   :  { %v802_v45 = vmul.f32 %v2017_v2, %v795_v44 }
 0x37d   :  { %v806_v50 = vadd.f32 1e-05, %v802_v45 }
 0x37e   :  { %v797_v59 = vpop.xlane.xlu1 %796 }
 0x37f   :  { %1454 = vrsqrt.f32 %v806_v50  ;;  %v803_v52 = vmul.f32 %v2017_v2, %v797_v59 }
 0x381   :  { %v807_v53 = vadd.f32 1e-05, %v803_v52 }
 0x382   :  { %v799_v16 = vpop.xlane.xlu0 %798 }
 0x383   :  { %1456 = vrsqrt.f32 %v807_v53  ;;  %v804_v35 = vmul.f32 %v2017_v2, %v799_v16 }
 0x385   :  { %v808_v54 = vadd.f32 1e-05, %v804_v35 }
 0x386   :  { %v801_v55 = vpop.xlane.xlu1 %800 }
 0x387   :  { %1458 = vrsqrt.f32 %v808_v54  ;;  %v805_v60 = vmul.f32 %v2017_v2, %v801_v55 }
 0x389   :  { %v1455_v61 = vpop.eup %1454  ;;  %v809_v62 = vadd.f32 1e-05, %v805_v60 }
 0x38a   :  { %v814_v46 = vmul.f32 %v1455_v61, %v782_v12  ;;  %v863_v41 = vpop.permute.xlu1 %862  ;;  %v868_v12 = vpop.permute.xlu0 %867 }
 0x38b   :  { %1460 = vrsqrt.f32 %v809_v62 }
 0x38c   :  { %v842_v63 = vmul.f32 %v825_v23, %v814_v46 }
 0x38d   :  { %v1457_v18 = vpop.eup %1456 }
 0x38e   :  { %v815_v10 = vmul.f32 %v1457_v18, %v783_v48  ;;  %v870_v6 = vadd.f32 %v853_v8, %v842_v63  ;;  %v890_v28 = vpop.permute.xlu0 %889  ;;  %v885_v31 = vpop.permute.xlu1 %884  ;;  %v1179_v8 = vld [vmem:[%s2100_s15] sm:$0xff] }
 0x390   :  { %v843_v57 = vmul.f32 %v830_v14, %v815_v10  ;;  %v874_v19 = vmax.f32 %v870_v6, 0.0 }
 0x391   :  { %v1459_v47 = vpop.eup %1458 }
 0x392   :  { %v816_v36 = vmul.f32 %v1459_v47, %v784_v30  ;;  %v871_v3 = vadd.f32 %v858_v38, %v843_v57  ;;  %v1013_v38 = vld [vmem:[%s2099_s12] sm:$0xff] }
 0x394   :  { %v844_v1 = vmul.f32 %v835_v40, %v816_v36  ;;  %v875_v9 = vmax.f32 %v871_v3, 0.0  ;;  %v1468_v40 = vmov 0.0|0.0  }
 0x395   :  { %v1461_v11 = vpop.eup %1460  ;;  %1425 = vmatprep.subr.bf16.mxu1 %v1468_v40 }
 0x396   :  { %v817_v58 = vmul.f32 %v1461_v11, %v785_v51  ;;  %v1417_v0 = vpack.c.bf16 %v875_v9, %v874_v19  ;;  %v872_v21 = vadd.f32 %v863_v41, %v844_v1  ;;  %v1000_v51 = vld [vmem:[%s2098_s11 + $0x8] sm:$0xff] }
 0x398   :  { %v845_v20 = vmul.f32 %v840_v39, %v817_v58  ;;  %1418 = vmatprep.subr.bf16.mxu0 %v1417_v0  ;;  %v876_v32 = vmax.f32 %v872_v21, 0.0  ;;  %v1014_v39 = vld [vmem:[%s2099_s12 + $0x8] sm:$0xff] }
 0x399   :  { %1420 = vmatpush3.bf16.msra.mxu0 %v1417_v0 }
 0x39a   :  { %v873_v5 = vadd.f32 %v868_v12, %v845_v20 }
 0x39c   :  { %v877_v25 = vmax.f32 %v873_v5, 0.0 }
 0x39e   :  { %v1421_v48 = vpack.c.bf16 %v877_v25, %v876_v32 }
 0x3a0   :  { %1422 = vmatprep.subr.bf16.mxu0 %v1421_v48 }
 0x3a1   :  { %1424 = vmatpush3.bf16.msra.mxu0 %v1421_v48 }
 0x3a2   :  { %1341 = vmatprep.subr.mxu0 %v1467_v4 }
 0x3a4   :  { %1339 = vmatmul.mubr.msk.f32.vlgmr.msra.gmra.mrb[8].mxu0 %vm102_vm0, %v879_v17 }
 0x3a5   :  { %1342 = vmatpush3.msra.mxu0 %v1907_v24  ;;  %v999_v24 = vld [vmem:[%s2098_s11] sm:$0xff]  ;;  %1343 = vmatprep.mubr.msk.f32.mxu0 %vm1469_vm12, %v1467_v4 }
 0x477   :  { %v1340_v29 = vpop.f32.mrb[8].mxu0 }
 0x478   :  { %v970_v30 = vadd.f32 %v1340_v29, %v890_v28  ;;  %v964_v42 = vpop.f32.mrb[9].mxu0 }
 0x479   :  { %v965_v22 = vadd.f32 %v964_v42, %v885_v31 }
 0x47a   :  { %v974_v15 = vmul.f32 %v1830_v56, %v970_v30 }
 0x47b   :  { %v973_v13 = vmul.f32 %v1830_v56, %v965_v22 }
 0x47c   :  { %977 = vadd.xlane.f32.xlu0 %v974_v15 }
 0x47d   :  { %975 = vadd.xlane.f32.xlu1 %v973_v13 }
 0x48e   :  { %1008 = vperm.xlu1 %1433, %v1000_v51  }
 0x492   :  { %1003 = vperm.xlu0 %1432, %v999_v24  }
 0x509   :  { %v978_v7 = vpop.xlane.xlu0 %977 }
 0x50a   :  { %v980_v49 = vmul.f32 %v2017_v2, %v978_v7  ;;  %v976_v26 = vpop.xlane.xlu1 %975 }
 0x50b   :  { %v979_v43 = vmul.f32 %v2017_v2, %v976_v26 }
 0x50c   :  { %v982_v27 = vsub.f32 %v970_v30, %v980_v49 }
 0x50d   :  { %v981_v33 = vsub.f32 %v965_v22, %v979_v43 }
 0x50e   :  { %v984_v34 = vmul.f32 %v982_v27, %v982_v27  ;;  %v1009_v44 = vpop.permute.xlu1 %1008 }
 0x50f   :  { %v983_v37 = vmul.f32 %v981_v33, %v981_v33 }
 0x510   :  { %v986_v23 = vmul.f32 %v1830_v56, %v984_v34 }
 0x511   :  { %v985_v14 = vmul.f32 %v1830_v56, %v983_v37  ;;  %v1030_v56 = vld [vmem:[%s2101_s14] sm:$0xff]  ;;  %v1004_v45 = vpop.permute.xlu0 %1003 }
 0x512   :  { %989 = vadd.xlane.f32.xlu1 %v986_v23  ;;  %1344 = vmatmul.mubr.msk.f32.vlgmr.msra.gmra.mrb[10].mxu0 %vm1031_vm11, %v1030_v56 }
 0x513   :  { %987 = vadd.xlane.f32.xlu0 %v985_v14 }
 0x523   :  { %1017 = vperm.xlu1 %1433, %v1013_v38  }
 0x527   :  { %1182 = vperm.xlu1 %1433, %v1179_v8  }
 0x529   :  { %1022 = vperm.xlu0 %1432, %v1014_v39  }
 0x59f   :  { %v990_v50 = vpop.xlane.xlu1 %989 }
 0x5a0   :  { %v992_v59 = vmul.f32 %v2017_v2, %v990_v50  ;;  %v988_v52 = vpop.xlane.xlu0 %987 }
 0x5a1   :  { %v991_v53 = vmul.f32 %v2017_v2, %v988_v52  ;;  %v1029_v2 = vld [vmem:[%s2102_s13] sm:$0xff] }
 0x5a2   :  { %v994_v16 = vadd.f32 1e-05, %v992_v59 }
 0x5a3   :  { %v993_v35 = vadd.f32 1e-05, %v991_v53  ;;  %v1018_v63 = vpop.permute.xlu1 %1017 }
 0x5a4   :  { %1462 = vrsqrt.f32 %v994_v16 }
 0x5a5   :  { %1464 = vrsqrt.f32 %v993_v35 }
 0x5a7   :  { %v1183_v11 = vpop.permute.xlu1 %1182 }
 0x5a8   :  { %v1023_v46 = vpop.permute.xlu0 %1022 }
 0x5ae   :  { %v1463_v54 = vpop.eup %1462 }
 0x5af   :  { %v1465_v55 = vpop.eup %1464  ;;  %v998_v4 = vmul.f32 %v1463_v54, %v982_v27 }
 0x5b0   :  { %v997_v60 = vmul.f32 %v1465_v55, %v981_v33 }
 0x5b1   :  { %v1012_v61 = vmul.f32 %v1009_v44, %v998_v4 }
 0x5b2   :  { %v1011_v62 = vmul.f32 %v1004_v45, %v997_v60 }
 0x5b3   :  { %v1026_v18 = vadd.f32 %v1023_v46, %v1012_v61 }
 0x5b4   :  { %v1025_v10 = vadd.f32 %v1018_v63, %v1011_v62 }
 0x5b5   :  { %v1028_v57 = vmax.f32 %v1026_v18, 0.0 }
 0x5b6   :  { %v1027_v6 = vmax.f32 %v1025_v10, 0.0 }
 0x5b8   :  { %v1426_v47 = vpack.c.bf16 %v1028_v57, %v1027_v6 }
 0x5ba   :  { %1427 = vmatpush3.bf16.msra.mxu1 %v1426_v47 }
 0x5bd   :  { %1351 = vmatmul.mubr.msk.f32.vlgmr.msra.gmra.mrb[8].mxu1 %vm1105_vm13, %v1029_v2 }
 0x5e5   :  { %v1101_v36 = vpop.f32.mrb[10].mxu0 }
 0x5e6   :  { %v1345_v3 = vpop.f32.mrb[11].mxu0 }
 0x690   :  { %v1175_v1 = vpop.f32.mrb[8].mxu1 }
 0x691   :  { %v1176_v19 = vadd.f32 %v1175_v1, %v1101_v36  ;;  %v1352_v9 = vpop.f32.mrb[9].mxu1 }
 0x693   :  { %v1185_v58 = vadd.f32 %v1183_v11, %v1176_v19 }
 0x695   :  { %1186 = vst [vmem:[%s2103_s16] sm:$0xff] %v1185_v58 }

</bundles_post_ra>
